<compile_context>
chip_gen: v5e
topology: v5e:2x2
jax: 0.10.0
libtpu: 0.0.40
codegen_flags: <defaults>
</compile_context>

<pallas_src>
import functools

import numpy as np
import jax
import jax.numpy as jnp
from jax import lax
from jax.experimental import pallas as pl
from jax.experimental.pallas import tpu as pltpu


_LANE = 128
_BF16_SUBLANE = 16           # bf16 vreg = [16, 128]
_UNROLL_THRESHOLD = 16       # fully unroll the D sequential passes only for small D


# -----------------------------------------------------------------------------
# Pallas kernel
# -----------------------------------------------------------------------------
def _made_kernel(n_hidden, input_size, d_pad, dot_dtype,
                 z_ref, w_in_ref, b_in_ref, w_h_ref, b_h_ref,
                 w_out_ref, b_out_ref, x_out_ref, logdet_out_ref):
    z = z_ref[...]                                   # (bm, Dp) f32

    # Hoist the tiny (1, N) bias rows once; let the `+ b` broadcast at the add
    # site (cheap sublane broadcast, no bm-row materialization -> no spills).
    b_in = b_in_ref[...]                             # (1, Hp)   f32
    b_h = [b_h_ref[l] for l in range(n_hidden)]      # (1, Hp)   f32 each
    b_out = b_out_ref[...]                           # (1, 2Dp)  f32

    def net(x):
        # Weights are read at the dot site: the blocks are already resident in
        # VMEM via BlockSpec and vlds are nearly free; hoisting (Hp,Hp) values
        # would only force spill/reload at large Hp.
        h = jnp.dot(x.astype(dot_dtype), w_in_ref[...],
                    preferred_element_type=jnp.float32) + b_in
        h = jnp.maximum(h, 0.0).astype(dot_dtype)           # fused ReLU + cast
        for l in range(n_hidden):
            h = jnp.dot(h, w_h_ref[l],
                        preferred_element_type=jnp.float32) + b_h[l]
            h = jnp.maximum(h, 0.0).astype(dot_dtype)
        # Fused mu / log_sigma projection: one MXU dot, static lane-aligned
        # split at d_pad (a 128 multiple).
        out = jnp.dot(h, w_out_ref[...],
                      preferred_element_type=jnp.float32) + b_out
        return out[:, :d_pad], out[:, d_pad:]

    def one_pass(x):
        mu, log_sigma = net(x)
        return mu + jnp.exp(log_sigma) * z, log_sigma

    x = z
    log_sigma = jnp.zeros_like(z)
    if input_size <= _UNROLL_THRESHOLD:
        # Small D: static unroll (passes are serially dependent anyway).
        for _ in range(input_size):
            x, log_sigma = one_pass(x)
    else:
        # Realistic D (e.g. 784): bound vreg pressure / compile time.
        x, log_sigma = lax.fori_loop(
            0, input_size, lambda i, c: one_pass(c[0]), (x, log_sigma),
            unroll=2)

    x_out_ref[...] = x.astype(x_out_ref.dtype)
    # Padded lanes of log_sigma are exactly 0 (zero-padded weights & biases),
    # so the full-lane-width sum is exact.  The log_det block is lane-dense
    # (bm, 128): the scalar is replicated across lanes and sliced in the
    # wrapper, avoiding masked vst.msk partial stores.
    ld = -jnp.sum(log_sigma, axis=1, keepdims=True)
    logdet_out_ref[...] = jnp.broadcast_to(
        ld, logdet_out_ref.shape).astype(logdet_out_ref.dtype)


# -----------------------------------------------------------------------------
# Masks + deterministic parameter init (matching the PyTorch reference)
# -----------------------------------------------------------------------------
def create_masks(input_size, hidden_size, n_hidden):
    """Sequential (natural) ordering masks, identical to MADE.create_masks."""
    input_degrees = np.arange(input_size)
    degrees = [input_degrees]
    for _ in range(n_hidden + 1):
        degrees.append(np.arange(hidden_size) % (input_size - 1))
    degrees.append(np.arange(input_size) % input_size - 1)
    masks = []
    for d0, d1 in zip(degrees[:-1], degrees[1:]):
        masks.append((d1[:, None] >= d0[None, :]).astype(np.float32))
    return masks  # shapes: (H, D), (H, H)*n_hidden, (D, H)


def init_made_params(input_size, hidden_size, n_hidden, key):
    """Deterministic synthetic init (PyTorch-Linear-style uniform, scaled down
    for numerical stability over the D sequential exp() passes)."""
    masks = create_masks(input_size, hidden_size, n_hidden)
    layer_dims = [(input_size, hidden_size)]
    layer_dims += [(hidden_size, hidden_size)] * n_hidden
    layer_dims += [(hidden_size, 2 * input_size)]

    weights, biases = [], []
    for (fan_in, fan_out) in layer_dims:
        key, kw, kb = jax.random.split(key, 3)
        bound = 0.1 / np.sqrt(fan_in)
        w = jax.random.uniform(kw, (fan_out, fan_in), jnp.float32, -bound, bound)
        b = jax.random.uniform(kb, (fan_out,), jnp.float32, -bound, bound)
        weights.append(w)
        biases.append(b)

    full_masks = [jnp.asarray(m) for m in masks[:-1]]
    full_masks.append(jnp.asarray(np.tile(masks[-1], (2, 1))))
    masked_weights = [m * w for m, w in zip(full_masks, weights)]
    return masked_weights, biases


# -----------------------------------------------------------------------------
# Wrapper: padding, layout, BlockSpecs, pallas_call
# -----------------------------------------------------------------------------
def _round_up(x, m):
    return (x + m - 1) // m * m


def _pad_to(a, shape):
    return jnp.pad(a, [(0, s - d) for s, d in zip(shape, a.shape)])


def prepare_made_params(masked_weights, biases, input_size, n_hidden,
                        *, dot_dtype=jnp.bfloat16):
    """One-time padding / transpose / stacking / bf16 cast of the parameters.

    Kept out of the per-call hot path: for this small kernel the XLA pad /
    concat / cast ops would otherwise cost as much as the kernel itself.
    """
    D = input_size
    H = masked_weights[0].shape[0]
    Dp = _round_up(D, _LANE)
    Hp = _round_up(H, _LANE)

    w_in = _pad_to(masked_weights[0].T, (Dp, Hp)).astype(dot_dtype)        # (Dp,Hp)
    b_in = _pad_to(biases[0][None, :], (1, Hp)).astype(jnp.float32)        # (1,Hp)

    if n_hidden > 0:
        w_h = jnp.stack([_pad_to(masked_weights[1 + l].T, (Hp, Hp))
                         for l in range(n_hidden)]).astype(dot_dtype)      # (nh,Hp,Hp)
        b_h = jnp.stack([_pad_to(biases[1 + l][None, :], (1, Hp))
                         for l in range(n_hidden)]).astype(jnp.float32)    # (nh,1,Hp)
    else:
        # Minimal placeholders (never indexed in the kernel) so the argument
        # list stays static without DMAing a full (1,Hp,Hp) block of dead data.
        w_h = jnp.zeros((1, 8, _LANE), dot_dtype)
        b_h = jnp.zeros((1, 1, _LANE), jnp.float32)

    w_last = masked_weights[-1]                                            # (2D, H)
    b_last = biases[-1]                                                    # (2D,)
    w_mu_t = _pad_to(w_last[:D, :].T, (Hp, Dp))
    w_ls_t = _pad_to(w_last[D:, :].T, (Hp, Dp))
    w_out = jnp.concatenate([w_mu_t, w_ls_t], axis=1).astype(dot_dtype)    # (Hp,2Dp)
    b_mu = _pad_to(b_last[:D][None, :], (1, Dp))
    b_ls = _pad_to(b_last[D:][None, :], (1, Dp))
    b_out = jnp.concatenate([b_mu, b_ls], axis=1).astype(jnp.float32)      # (1,2Dp)

    params = jax.device_put((w_in, b_in, w_h, b_h, w_out, b_out))
    return params, (Dp, Hp)


def _choose_batch_tile(B):
    """Pick a bf16-packed (multiple-of-16) batch tile that (a) minimizes
    batch-padding waste and (b) yields >=2 grid steps when the batch allows,
    so `dimension_semantics=("parallel",)` gives v7x's 2nd TensorCore work."""
    B16 = _round_up(max(B, 1), _BF16_SUBLANE)
    if B16 <= _BF16_SUBLANE:
        return _BF16_SUBLANE
    bm = min(256, _round_up(pl.cdiv(B16, 2), _BF16_SUBLANE))
    return max(bm, _BF16_SUBLANE)


def made_forward_pallas(z, params, meta, input_size, n_hidden):
    w_in, b_in, w_h, b_h, w_out, b_out = params
    Dp, Hp = meta
    B, D = z.shape
    assert D == input_size
    dot_dtype = w_in.dtype

    bm = _choose_batch_tile(B)
    B_pad = _round_up(B, bm)
    grid = (B_pad // bm,)

    z_p = _pad_to(z.astype(jnp.float32), (B_pad, Dp))

    vmem = pltpu.MemorySpace.VMEM
    in_specs = [
        pl.BlockSpec((bm, Dp), lambda i: (i, 0), memory_space=vmem),          # z
        pl.BlockSpec((Dp, Hp), lambda i: (0, 0), memory_space=vmem),          # w_in
        pl.BlockSpec((1, Hp), lambda i: (0, 0), memory_space=vmem),           # b_in
        pl.BlockSpec(w_h.shape, lambda i: (0, 0, 0), memory_space=vmem),      # w_h
        pl.BlockSpec(b_h.shape, lambda i: (0, 0, 0), memory_space=vmem),      # b_h
        pl.BlockSpec((Hp, 2 * Dp), lambda i: (0, 0), memory_space=vmem),      # w_out
        pl.BlockSpec((1, 2 * Dp), lambda i: (0, 0), memory_space=vmem),       # b_out
    ]
    out_specs = (
        pl.BlockSpec((bm, Dp), lambda i: (i, 0), memory_space=vmem),          # x
        pl.BlockSpec((bm, _LANE), lambda i: (i, 0), memory_space=vmem),       # log_det
    )
    out_shapes = (
        jax.ShapeDtypeStruct((B_pad, Dp), jnp.float32),
        jax.ShapeDtypeStruct((B_pad, _LANE), jnp.float32),
    )

    # Scoped-VMEM budget: 2x (pipeline buffering) of weights + z/x/logdet
    # blocks, floored at 32 MiB (v5e's scoped default is only 16 MiB) and
    # capped at 64 MiB (v7x's physical VMEM).
    def nbytes(a):
        return int(np.prod(a.shape)) * jnp.dtype(a.dtype).itemsize
    weight_bytes = sum(nbytes(a) for a in (w_in, b_in, w_h, b_h, w_out, b_out))
    block_bytes = (2 * bm * Dp + bm * _LANE) * 4
    vmem_limit = int(min(max(2 * (weight_bytes + block_bytes) + (4 << 20),
                             32 << 20),
                         64 << 20))

    kernel = functools.partial(_made_kernel, n_hidden, input_size, Dp, dot_dtype)
    x_p, logdet_p = pl.pallas_call(
        kernel,
        grid=grid,
        in_specs=in_specs,
        out_specs=out_specs,
        out_shape=out_shapes,
        compiler_params=pltpu.CompilerParams(
            dimension_semantics=("parallel",),
            vmem_limit_bytes=vmem_limit),
    )(z_p, w_in, b_in, w_h, b_h, w_out, b_out)

    return x_p[:B, :D], logdet_p[:B, 0]


# -----------------------------------------------------------------------------
# Pure-JAX reference (f32, unpadded) replicating the PyTorch forward semantics
# -----------------------------------------------------------------------------
def made_forward_reference(z, masked_weights, biases, input_size, n_hidden):
    def net(x):
        h = x
        for l in range(n_hidden + 1):
            h = jnp.maximum(h @ masked_weights[l].T + biases[l], 0.0)
        out = h @ masked_weights[-1].T + biases[-1]
        return out[:, :input_size], out[:, input_size:]

    x = z
    log_sigma = jnp.zeros_like(z)
    for _ in range(input_size):
        mu, log_sigma = net(x)
        x = mu + jnp.exp(log_sigma) * z
    return x, -jnp.sum(log_sigma, axis=1)


if __name__ == "__main__":
    input_size = 8
    hidden_size = 32
    n_hidden = 2
    batch = 8

    key = jax.random.PRNGKey(0)
    key, kz, kp = jax.random.split(key, 3)
    z = jax.random.normal(kz, (batch, input_size), jnp.float32)

    masked_weights, biases = init_made_params(input_size, hidden_size, n_hidden, kp)

    # One-time parameter preprocessing (out of the per-call hot path).
    params, meta = prepare_made_params(masked_weights, biases,
                                       input_size, n_hidden)

    x, log_det = made_forward_pallas(z, params, meta, input_size, n_hidden)
    x = jax.block_until_ready(x)
    log_det = jax.block_until_ready(log_det)

    x_ref, log_det_ref = made_forward_reference(
        z, masked_weights, biases, input_size, n_hidden)

    assert x.shape == (batch, input_size)
    assert log_det.shape == (batch,)
    # bf16 MXU operands (f32 accumulation) -> relaxed tolerance vs f32 reference.
    # NOTE: for large D / large |log_sigma|, re-validate; keep w_out in f32 if
    # drift appears (log_sigma producer).
    np.testing.assert_allclose(np.asarray(x), np.asarray(x_ref), rtol=1e-2, atol=1e-2)
    np.testing.assert_allclose(np.asarray(log_det), np.asarray(log_det_ref),
                               rtol=1e-2, atol=1e-2)

    # TODO(synk): MADE.inverse (x -> z) is a single net() pass; not implemented here.
    print("KERNEL_OK")
</pallas_src>

<mosaic_0001>
module attributes {stable_mosaic.version = 11 : i64} {
  func.func @_made_kernel(%arg0: i32, %arg1: memref<16x128xf32, #tpu.memory_space<vmem>>, %arg2: memref<128x128xbf16, #tpu.memory_space<vmem>>, %arg3: memref<1x128xf32, #tpu.memory_space<vmem>>, %arg4: memref<2x128x128xbf16, #tpu.memory_space<vmem>>, %arg5: memref<2x1x128xf32, #tpu.memory_space<vmem>>, %arg6: memref<128x256xbf16, #tpu.memory_space<vmem>>, %arg7: memref<1x256xf32, #tpu.memory_space<vmem>>, %arg8: memref<16x128xf32, #tpu.memory_space<vmem>>, %arg9: memref<16x128xf32, #tpu.memory_space<vmem>>) attributes {dimension_semantics = [#tpu.dimension_semantics<parallel>], iteration_bounds = array<i64: 1>, scalar_prefetch = 0 : i64, scratch_operands = 0 : i64, tpu.core_type = #tpu.core_type<tc>, window_params = [{transform_indices = @transform_0, window_bounds = array<i64: 16, 128>}, {pipeline_mode = #tpu.pipeline_mode<synchronous>, transform_indices = @transform_1, window_bounds = array<i64: 128, 128>}, {pipeline_mode = #tpu.pipeline_mode<synchronous>, transform_indices = @transform_2, window_bounds = array<i64: 1, 128>}, {pipeline_mode = #tpu.pipeline_mode<synchronous>, transform_indices = @transform_3, window_bounds = array<i64: 2, 128, 128>}, {pipeline_mode = #tpu.pipeline_mode<synchronous>, transform_indices = @transform_4, window_bounds = array<i64: 2, 1, 128>}, {pipeline_mode = #tpu.pipeline_mode<synchronous>, transform_indices = @transform_5, window_bounds = array<i64: 128, 256>}, {pipeline_mode = #tpu.pipeline_mode<synchronous>, transform_indices = @transform_6, window_bounds = array<i64: 1, 256>}, {transform_indices = @transform_7, window_bounds = array<i64: 16, 128>}, {transform_indices = @transform_8, window_bounds = array<i64: 16, 128>}]} {
    %c0 = arith.constant 0 : index
    %c0_0 = arith.constant 0 : index
    %0 = vector.load %arg1[%c0, %c0_0] : memref<16x128xf32, #tpu.memory_space<vmem>>, vector<16x128xf32>
    %c0_1 = arith.constant 0 : index
    %c0_2 = arith.constant 0 : index
    %1 = vector.load %arg3[%c0_1, %c0_2] : memref<1x128xf32, #tpu.memory_space<vmem>>, vector<1x128xf32>
    %c0_3 = arith.constant 0 : index
    %c0_4 = arith.constant 0 : index
    %c0_5 = arith.constant 0 : index
    %2 = vector.load %arg5[%c0_3, %c0_4, %c0_5] : memref<2x1x128xf32, #tpu.memory_space<vmem>>, vector<1x1x128xf32>
    %3 = vector.shape_cast %2 : vector<1x1x128xf32> to vector<1x128xf32>
    %c1 = arith.constant 1 : index
    %c0_6 = arith.constant 0 : index
    %c0_7 = arith.constant 0 : index
    %4 = vector.load %arg5[%c1, %c0_6, %c0_7] : memref<2x1x128xf32, #tpu.memory_space<vmem>>, vector<1x1x128xf32>
    %5 = vector.shape_cast %4 : vector<1x1x128xf32> to vector<1x128xf32>
    %c0_8 = arith.constant 0 : index
    %c0_9 = arith.constant 0 : index
    %6 = vector.load %arg7[%c0_8, %c0_9] : memref<1x256xf32, #tpu.memory_space<vmem>>, vector<1x256xf32>
    %7 = arith.truncf %0 : vector<16x128xf32> to vector<16x128xbf16>
    %c0_10 = arith.constant 0 : index
    %c0_11 = arith.constant 0 : index
    %8 = vector.load %arg2[%c0_10, %c0_11] : memref<128x128xbf16, #tpu.memory_space<vmem>>, vector<128x128xbf16>
    %cst = arith.constant dense<0.000000e+00> : vector<16x128xf32>
    %9 = tpu.matmul %7, %8, %cst {dimension_numbers = #tpu.dot_dimension_numbers<[1], [0], [0], [1], [0, 0, 1, 1], [], []>} : vector<16x128xbf16>, vector<128x128xbf16>, vector<16x128xf32> -> vector<16x128xf32>
    %10 = vector.broadcast %1 : vector<1x128xf32> to vector<16x128xf32>
    %11 = arith.addf %9, %10 : vector<16x128xf32>
    %cst_12 = arith.constant 0.000000e+00 : f32
    %12 = vector.broadcast %cst_12 : f32 to vector<16x128xf32>
    %13 = arith.maximumf %11, %12 : vector<16x128xf32>
    %14 = arith.truncf %13 : vector<16x128xf32> to vector<16x128xbf16>
    %c0_13 = arith.constant 0 : index
    %c0_14 = arith.constant 0 : index
    %c0_15 = arith.constant 0 : index
    %15 = vector.load %arg4[%c0_13, %c0_14, %c0_15] : memref<2x128x128xbf16, #tpu.memory_space<vmem>>, vector<1x128x128xbf16>
    %16 = vector.shape_cast %15 : vector<1x128x128xbf16> to vector<128x128xbf16>
    %cst_16 = arith.constant dense<0.000000e+00> : vector<16x128xf32>
    %17 = tpu.matmul %14, %16, %cst_16 {dimension_numbers = #tpu.dot_dimension_numbers<[1], [0], [0], [1], [0, 0, 1, 1], [], []>} : vector<16x128xbf16>, vector<128x128xbf16>, vector<16x128xf32> -> vector<16x128xf32>
    %18 = vector.broadcast %3 : vector<1x128xf32> to vector<16x128xf32>
    %19 = arith.addf %17, %18 : vector<16x128xf32>
    %cst_17 = arith.constant 0.000000e+00 : f32
    %20 = vector.broadcast %cst_17 : f32 to vector<16x128xf32>
    %21 = arith.maximumf %19, %20 : vector<16x128xf32>
    %22 = arith.truncf %21 : vector<16x128xf32> to vector<16x128xbf16>
    %c1_18 = arith.constant 1 : index
    %c0_19 = arith.constant 0 : index
    %c0_20 = arith.constant 0 : index
    %23 = vector.load %arg4[%c1_18, %c0_19, %c0_20] : memref<2x128x128xbf16, #tpu.memory_space<vmem>>, vector<1x128x128xbf16>
    %24 = vector.shape_cast %23 : vector<1x128x128xbf16> to vector<128x128xbf16>
    %cst_21 = arith.constant dense<0.000000e+00> : vector<16x128xf32>
    %25 = tpu.matmul %22, %24, %cst_21 {dimension_numbers = #tpu.dot_dimension_numbers<[1], [0], [0], [1], [0, 0, 1, 1], [], []>} : vector<16x128xbf16>, vector<128x128xbf16>, vector<16x128xf32> -> vector<16x128xf32>
    %26 = vector.broadcast %5 : vector<1x128xf32> to vector<16x128xf32>
    %27 = arith.addf %25, %26 : vector<16x128xf32>
    %cst_22 = arith.constant 0.000000e+00 : f32
    %28 = vector.broadcast %cst_22 : f32 to vector<16x128xf32>
    %29 = arith.maximumf %27, %28 : vector<16x128xf32>
    %30 = arith.truncf %29 : vector<16x128xf32> to vector<16x128xbf16>
    %c0_23 = arith.constant 0 : index
    %c0_24 = arith.constant 0 : index
    %31 = vector.load %arg6[%c0_23, %c0_24] : memref<128x256xbf16, #tpu.memory_space<vmem>>, vector<128x256xbf16>
    %cst_25 = arith.constant dense<0.000000e+00> : vector<16x256xf32>
    %32 = tpu.matmul %30, %31, %cst_25 {dimension_numbers = #tpu.dot_dimension_numbers<[1], [0], [0], [1], [0, 0, 1, 1], [], []>} : vector<16x128xbf16>, vector<128x256xbf16>, vector<16x256xf32> -> vector<16x256xf32>
    %33 = vector.broadcast %6 : vector<1x256xf32> to vector<16x256xf32>
    %34 = arith.addf %32, %33 : vector<16x256xf32>
    %35 = vector.extract_strided_slice %34 {offsets = [0, 0], sizes = [16, 128], strides = [1, 1]} : vector<16x256xf32> to vector<16x128xf32>
    %36 = vector.extract_strided_slice %34 {offsets = [0, 128], sizes = [16, 128], strides = [1, 1]} : vector<16x256xf32> to vector<16x128xf32>
    %37 = math.exp %36 : vector<16x128xf32>
    %38 = arith.mulf %37, %0 : vector<16x128xf32>
    %39 = arith.addf %35, %38 : vector<16x128xf32>
    %40 = arith.truncf %39 : vector<16x128xf32> to vector<16x128xbf16>
    %c0_26 = arith.constant 0 : index
    %c0_27 = arith.constant 0 : index
    %41 = vector.load %arg2[%c0_26, %c0_27] : memref<128x128xbf16, #tpu.memory_space<vmem>>, vector<128x128xbf16>
    %cst_28 = arith.constant dense<0.000000e+00> : vector<16x128xf32>
    %42 = tpu.matmul %40, %41, %cst_28 {dimension_numbers = #tpu.dot_dimension_numbers<[1], [0], [0], [1], [0, 0, 1, 1], [], []>} : vector<16x128xbf16>, vector<128x128xbf16>, vector<16x128xf32> -> vector<16x128xf32>
    %43 = vector.broadcast %1 : vector<1x128xf32> to vector<16x128xf32>
    %44 = arith.addf %42, %43 : vector<16x128xf32>
    %cst_29 = arith.constant 0.000000e+00 : f32
    %45 = vector.broadcast %cst_29 : f32 to vector<16x128xf32>
    %46 = arith.maximumf %44, %45 : vector<16x128xf32>
    %47 = arith.truncf %46 : vector<16x128xf32> to vector<16x128xbf16>
    %c0_30 = arith.constant 0 : index
    %c0_31 = arith.constant 0 : index
    %c0_32 = arith.constant 0 : index
    %48 = vector.load %arg4[%c0_30, %c0_31, %c0_32] : memref<2x128x128xbf16, #tpu.memory_space<vmem>>, vector<1x128x128xbf16>
    %49 = vector.shape_cast %48 : vector<1x128x128xbf16> to vector<128x128xbf16>
    %cst_33 = arith.constant dense<0.000000e+00> : vector<16x128xf32>
    %50 = tpu.matmul %47, %49, %cst_33 {dimension_numbers = #tpu.dot_dimension_numbers<[1], [0], [0], [1], [0, 0, 1, 1], [], []>} : vector<16x128xbf16>, vector<128x128xbf16>, vector<16x128xf32> -> vector<16x128xf32>
    %51 = vector.broadcast %3 : vector<1x128xf32> to vector<16x128xf32>
    %52 = arith.addf %50, %51 : vector<16x128xf32>
    %cst_34 = arith.constant 0.000000e+00 : f32
    %53 = vector.broadcast %cst_34 : f32 to vector<16x128xf32>
    %54 = arith.maximumf %52, %53 : vector<16x128xf32>
    %55 = arith.truncf %54 : vector<16x128xf32> to vector<16x128xbf16>
    %c1_35 = arith.constant 1 : index
    %c0_36 = arith.constant 0 : index
    %c0_37 = arith.constant 0 : index
    %56 = vector.load %arg4[%c1_35, %c0_36, %c0_37] : memref<2x128x128xbf16, #tpu.memory_space<vmem>>, vector<1x128x128xbf16>
    %57 = vector.shape_cast %56 : vector<1x128x128xbf16> to vector<128x128xbf16>
    %cst_38 = arith.constant dense<0.000000e+00> : vector<16x128xf32>
    %58 = tpu.matmul %55, %57, %cst_38 {dimension_numbers = #tpu.dot_dimension_numbers<[1], [0], [0], [1], [0, 0, 1, 1], [], []>} : vector<16x128xbf16>, vector<128x128xbf16>, vector<16x128xf32> -> vector<16x128xf32>
    %59 = vector.broadcast %5 : vector<1x128xf32> to vector<16x128xf32>
    %60 = arith.addf %58, %59 : vector<16x128xf32>
    %cst_39 = arith.constant 0.000000e+00 : f32
    %61 = vector.broadcast %cst_39 : f32 to vector<16x128xf32>
    %62 = arith.maximumf %60, %61 : vector<16x128xf32>
    %63 = arith.truncf %62 : vector<16x128xf32> to vector<16x128xbf16>
    %c0_40 = arith.constant 0 : index
    %c0_41 = arith.constant 0 : index
    %64 = vector.load %arg6[%c0_40, %c0_41] : memref<128x256xbf16, #tpu.memory_space<vmem>>, vector<128x256xbf16>
    %cst_42 = arith.constant dense<0.000000e+00> : vector<16x256xf32>
    %65 = tpu.matmul %63, %64, %cst_42 {dimension_numbers = #tpu.dot_dimension_numbers<[1], [0], [0], [1], [0, 0, 1, 1], [], []>} : vector<16x128xbf16>, vector<128x256xbf16>, vector<16x256xf32> -> vector<16x256xf32>
    %66 = vector.broadcast %6 : vector<1x256xf32> to vector<16x256xf32>
    %67 = arith.addf %65, %66 : vector<16x256xf32>
    %68 = vector.extract_strided_slice %67 {offsets = [0, 0], sizes = [16, 128], strides = [1, 1]} : vector<16x256xf32> to vector<16x128xf32>
    %69 = vector.extract_strided_slice %67 {offsets = [0, 128], sizes = [16, 128], strides = [1, 1]} : vector<16x256xf32> to vector<16x128xf32>
    %70 = math.exp %69 : vector<16x128xf32>
    %71 = arith.mulf %70, %0 : vector<16x128xf32>
    %72 = arith.addf %68, %71 : vector<16x128xf32>
    %73 = arith.truncf %72 : vector<16x128xf32> to vector<16x128xbf16>
    %c0_43 = arith.constant 0 : index
    %c0_44 = arith.constant 0 : index
    %74 = vector.load %arg2[%c0_43, %c0_44] : memref<128x128xbf16, #tpu.memory_space<vmem>>, vector<128x128xbf16>
    %cst_45 = arith.constant dense<0.000000e+00> : vector<16x128xf32>
    %75 = tpu.matmul %73, %74, %cst_45 {dimension_numbers = #tpu.dot_dimension_numbers<[1], [0], [0], [1], [0, 0, 1, 1], [], []>} : vector<16x128xbf16>, vector<128x128xbf16>, vector<16x128xf32> -> vector<16x128xf32>
    %76 = vector.broadcast %1 : vector<1x128xf32> to vector<16x128xf32>
    %77 = arith.addf %75, %76 : vector<16x128xf32>
    %cst_46 = arith.constant 0.000000e+00 : f32
    %78 = vector.broadcast %cst_46 : f32 to vector<16x128xf32>
    %79 = arith.maximumf %77, %78 : vector<16x128xf32>
    %80 = arith.truncf %79 : vector<16x128xf32> to vector<16x128xbf16>
    %c0_47 = arith.constant 0 : index
    %c0_48 = arith.constant 0 : index
    %c0_49 = arith.constant 0 : index
    %81 = vector.load %arg4[%c0_47, %c0_48, %c0_49] : memref<2x128x128xbf16, #tpu.memory_space<vmem>>, vector<1x128x128xbf16>
    %82 = vector.shape_cast %81 : vector<1x128x128xbf16> to vector<128x128xbf16>
    %cst_50 = arith.constant dense<0.000000e+00> : vector<16x128xf32>
    %83 = tpu.matmul %80, %82, %cst_50 {dimension_numbers = #tpu.dot_dimension_numbers<[1], [0], [0], [1], [0, 0, 1, 1], [], []>} : vector<16x128xbf16>, vector<128x128xbf16>, vector<16x128xf32> -> vector<16x128xf32>
    %84 = vector.broadcast %3 : vector<1x128xf32> to vector<16x128xf32>
    %85 = arith.addf %83, %84 : vector<16x128xf32>
    %cst_51 = arith.constant 0.000000e+00 : f32
    %86 = vector.broadcast %cst_51 : f32 to vector<16x128xf32>
    %87 = arith.maximumf %85, %86 : vector<16x128xf32>
    %88 = arith.truncf %87 : vector<16x128xf32> to vector<16x128xbf16>
    %c1_52 = arith.constant 1 : index
    %c0_53 = arith.constant 0 : index
    %c0_54 = arith.constant 0 : index
    %89 = vector.load %arg4[%c1_52, %c0_53, %c0_54] : memref<2x128x128xbf16, #tpu.memory_space<vmem>>, vector<1x128x128xbf16>
    %90 = vector.shape_cast %89 : vector<1x128x128xbf16> to vector<128x128xbf16>
    %cst_55 = arith.constant dense<0.000000e+00> : vector<16x128xf32>
    %91 = tpu.matmul %88, %90, %cst_55 {dimension_numbers = #tpu.dot_dimension_numbers<[1], [0], [0], [1], [0, 0, 1, 1], [], []>} : vector<16x128xbf16>, vector<128x128xbf16>, vector<16x128xf32> -> vector<16x128xf32>
    %92 = vector.broadcast %5 : vector<1x128xf32> to vector<16x128xf32>
    %93 = arith.addf %91, %92 : vector<16x128xf32>
    %cst_56 = arith.constant 0.000000e+00 : f32
    %94 = vector.broadcast %cst_56 : f32 to vector<16x128xf32>
    %95 = arith.maximumf %93, %94 : vector<16x128xf32>
    %96 = arith.truncf %95 : vector<16x128xf32> to vector<16x128xbf16>
    %c0_57 = arith.constant 0 : index
    %c0_58 = arith.constant 0 : index
    %97 = vector.load %arg6[%c0_57, %c0_58] : memref<128x256xbf16, #tpu.memory_space<vmem>>, vector<128x256xbf16>
    %cst_59 = arith.constant dense<0.000000e+00> : vector<16x256xf32>
    %98 = tpu.matmul %96, %97, %cst_59 {dimension_numbers = #tpu.dot_dimension_numbers<[1], [0], [0], [1], [0, 0, 1, 1], [], []>} : vector<16x128xbf16>, vector<128x256xbf16>, vector<16x256xf32> -> vector<16x256xf32>
    %99 = vector.broadcast %6 : vector<1x256xf32> to vector<16x256xf32>
    %100 = arith.addf %98, %99 : vector<16x256xf32>
    %101 = vector.extract_strided_slice %100 {offsets = [0, 0], sizes = [16, 128], strides = [1, 1]} : vector<16x256xf32> to vector<16x128xf32>
    %102 = vector.extract_strided_slice %100 {offsets = [0, 128], sizes = [16, 128], strides = [1, 1]} : vector<16x256xf32> to vector<16x128xf32>
    %103 = math.exp %102 : vector<16x128xf32>
    %104 = arith.mulf %103, %0 : vector<16x128xf32>
    %105 = arith.addf %101, %104 : vector<16x128xf32>
    %106 = arith.truncf %105 : vector<16x128xf32> to vector<16x128xbf16>
    %c0_60 = arith.constant 0 : index
    %c0_61 = arith.constant 0 : index
    %107 = vector.load %arg2[%c0_60, %c0_61] : memref<128x128xbf16, #tpu.memory_space<vmem>>, vector<128x128xbf16>
    %cst_62 = arith.constant dense<0.000000e+00> : vector<16x128xf32>
    %108 = tpu.matmul %106, %107, %cst_62 {dimension_numbers = #tpu.dot_dimension_numbers<[1], [0], [0], [1], [0, 0, 1, 1], [], []>} : vector<16x128xbf16>, vector<128x128xbf16>, vector<16x128xf32> -> vector<16x128xf32>
    %109 = vector.broadcast %1 : vector<1x128xf32> to vector<16x128xf32>
    %110 = arith.addf %108, %109 : vector<16x128xf32>
    %cst_63 = arith.constant 0.000000e+00 : f32
    %111 = vector.broadcast %cst_63 : f32 to vector<16x128xf32>
    %112 = arith.maximumf %110, %111 : vector<16x128xf32>
    %113 = arith.truncf %112 : vector<16x128xf32> to vector<16x128xbf16>
    %c0_64 = arith.constant 0 : index
    %c0_65 = arith.constant 0 : index
    %c0_66 = arith.constant 0 : index
    %114 = vector.load %arg4[%c0_64, %c0_65, %c0_66] : memref<2x128x128xbf16, #tpu.memory_space<vmem>>, vector<1x128x128xbf16>
    %115 = vector.shape_cast %114 : vector<1x128x128xbf16> to vector<128x128xbf16>
    %cst_67 = arith.constant dense<0.000000e+00> : vector<16x128xf32>
    %116 = tpu.matmul %113, %115, %cst_67 {dimension_numbers = #tpu.dot_dimension_numbers<[1], [0], [0], [1], [0, 0, 1, 1], [], []>} : vector<16x128xbf16>, vector<128x128xbf16>, vector<16x128xf32> -> vector<16x128xf32>
    %117 = vector.broadcast %3 : vector<1x128xf32> to vector<16x128xf32>
    %118 = arith.addf %116, %117 : vector<16x128xf32>
    %cst_68 = arith.constant 0.000000e+00 : f32
    %119 = vector.broadcast %cst_68 : f32 to vector<16x128xf32>
    %120 = arith.maximumf %118, %119 : vector<16x128xf32>
    %121 = arith.truncf %120 : vector<16x128xf32> to vector<16x128xbf16>
    %c1_69 = arith.constant 1 : index
    %c0_70 = arith.constant 0 : index
    %c0_71 = arith.constant 0 : index
    %122 = vector.load %arg4[%c1_69, %c0_70, %c0_71] : memref<2x128x128xbf16, #tpu.memory_space<vmem>>, vector<1x128x128xbf16>
    %123 = vector.shape_cast %122 : vector<1x128x128xbf16> to vector<128x128xbf16>
    %cst_72 = arith.constant dense<0.000000e+00> : vector<16x128xf32>
    %124 = tpu.matmul %121, %123, %cst_72 {dimension_numbers = #tpu.dot_dimension_numbers<[1], [0], [0], [1], [0, 0, 1, 1], [], []>} : vector<16x128xbf16>, vector<128x128xbf16>, vector<16x128xf32> -> vector<16x128xf32>
    %125 = vector.broadcast %5 : vector<1x128xf32> to vector<16x128xf32>
    %126 = arith.addf %124, %125 : vector<16x128xf32>
    %cst_73 = arith.constant 0.000000e+00 : f32
    %127 = vector.broadcast %cst_73 : f32 to vector<16x128xf32>
    %128 = arith.maximumf %126, %127 : vector<16x128xf32>
    %129 = arith.truncf %128 : vector<16x128xf32> to vector<16x128xbf16>
    %c0_74 = arith.constant 0 : index
    %c0_75 = arith.constant 0 : index
    %130 = vector.load %arg6[%c0_74, %c0_75] : memref<128x256xbf16, #tpu.memory_space<vmem>>, vector<128x256xbf16>
    %cst_76 = arith.constant dense<0.000000e+00> : vector<16x256xf32>
    %131 = tpu.matmul %129, %130, %cst_76 {dimension_numbers = #tpu.dot_dimension_numbers<[1], [0], [0], [1], [0, 0, 1, 1], [], []>} : vector<16x128xbf16>, vector<128x256xbf16>, vector<16x256xf32> -> vector<16x256xf32>
    %132 = vector.broadcast %6 : vector<1x256xf32> to vector<16x256xf32>
    %133 = arith.addf %131, %132 : vector<16x256xf32>
    %134 = vector.extract_strided_slice %133 {offsets = [0, 0], sizes = [16, 128], strides = [1, 1]} : vector<16x256xf32> to vector<16x128xf32>
    %135 = vector.extract_strided_slice %133 {offsets = [0, 128], sizes = [16, 128], strides = [1, 1]} : vector<16x256xf32> to vector<16x128xf32>
    %136 = math.exp %135 : vector<16x128xf32>
    %137 = arith.mulf %136, %0 : vector<16x128xf32>
    %138 = arith.addf %134, %137 : vector<16x128xf32>
    %139 = arith.truncf %138 : vector<16x128xf32> to vector<16x128xbf16>
    %c0_77 = arith.constant 0 : index
    %c0_78 = arith.constant 0 : index
    %140 = vector.load %arg2[%c0_77, %c0_78] : memref<128x128xbf16, #tpu.memory_space<vmem>>, vector<128x128xbf16>
    %cst_79 = arith.constant dense<0.000000e+00> : vector<16x128xf32>
    %141 = tpu.matmul %139, %140, %cst_79 {dimension_numbers = #tpu.dot_dimension_numbers<[1], [0], [0], [1], [0, 0, 1, 1], [], []>} : vector<16x128xbf16>, vector<128x128xbf16>, vector<16x128xf32> -> vector<16x128xf32>
    %142 = vector.broadcast %1 : vector<1x128xf32> to vector<16x128xf32>
    %143 = arith.addf %141, %142 : vector<16x128xf32>
    %cst_80 = arith.constant 0.000000e+00 : f32
    %144 = vector.broadcast %cst_80 : f32 to vector<16x128xf32>
    %145 = arith.maximumf %143, %144 : vector<16x128xf32>
    %146 = arith.truncf %145 : vector<16x128xf32> to vector<16x128xbf16>
    %c0_81 = arith.constant 0 : index
    %c0_82 = arith.constant 0 : index
    %c0_83 = arith.constant 0 : index
    %147 = vector.load %arg4[%c0_81, %c0_82, %c0_83] : memref<2x128x128xbf16, #tpu.memory_space<vmem>>, vector<1x128x128xbf16>
    %148 = vector.shape_cast %147 : vector<1x128x128xbf16> to vector<128x128xbf16>
    %cst_84 = arith.constant dense<0.000000e+00> : vector<16x128xf32>
    %149 = tpu.matmul %146, %148, %cst_84 {dimension_numbers = #tpu.dot_dimension_numbers<[1], [0], [0], [1], [0, 0, 1, 1], [], []>} : vector<16x128xbf16>, vector<128x128xbf16>, vector<16x128xf32> -> vector<16x128xf32>
    %150 = vector.broadcast %3 : vector<1x128xf32> to vector<16x128xf32>
    %151 = arith.addf %149, %150 : vector<16x128xf32>
    %cst_85 = arith.constant 0.000000e+00 : f32
    %152 = vector.broadcast %cst_85 : f32 to vector<16x128xf32>
    %153 = arith.maximumf %151, %152 : vector<16x128xf32>
    %154 = arith.truncf %153 : vector<16x128xf32> to vector<16x128xbf16>
    %c1_86 = arith.constant 1 : index
    %c0_87 = arith.constant 0 : index
    %c0_88 = arith.constant 0 : index
    %155 = vector.load %arg4[%c1_86, %c0_87, %c0_88] : memref<2x128x128xbf16, #tpu.memory_space<vmem>>, vector<1x128x128xbf16>
    %156 = vector.shape_cast %155 : vector<1x128x128xbf16> to vector<128x128xbf16>
    %cst_89 = arith.constant dense<0.000000e+00> : vector<16x128xf32>
    %157 = tpu.matmul %154, %156, %cst_89 {dimension_numbers = #tpu.dot_dimension_numbers<[1], [0], [0], [1], [0, 0, 1, 1], [], []>} : vector<16x128xbf16>, vector<128x128xbf16>, vector<16x128xf32> -> vector<16x128xf32>
    %158 = vector.broadcast %5 : vector<1x128xf32> to vector<16x128xf32>
    %159 = arith.addf %157, %158 : vector<16x128xf32>
    %cst_90 = arith.constant 0.000000e+00 : f32
    %160 = vector.broadcast %cst_90 : f32 to vector<16x128xf32>
    %161 = arith.maximumf %159, %160 : vector<16x128xf32>
    %162 = arith.truncf %161 : vector<16x128xf32> to vector<16x128xbf16>
    %c0_91 = arith.constant 0 : index
    %c0_92 = arith.constant 0 : index
    %163 = vector.load %arg6[%c0_91, %c0_92] : memref<128x256xbf16, #tpu.memory_space<vmem>>, vector<128x256xbf16>
    %cst_93 = arith.constant dense<0.000000e+00> : vector<16x256xf32>
    %164 = tpu.matmul %162, %163, %cst_93 {dimension_numbers = #tpu.dot_dimension_numbers<[1], [0], [0], [1], [0, 0, 1, 1], [], []>} : vector<16x128xbf16>, vector<128x256xbf16>, vector<16x256xf32> -> vector<16x256xf32>
    %165 = vector.broadcast %6 : vector<1x256xf32> to vector<16x256xf32>
    %166 = arith.addf %164, %165 : vector<16x256xf32>
    %167 = vector.extract_strided_slice %166 {offsets = [0, 0], sizes = [16, 128], strides = [1, 1]} : vector<16x256xf32> to vector<16x128xf32>
    %168 = vector.extract_strided_slice %166 {offsets = [0, 128], sizes = [16, 128], strides = [1, 1]} : vector<16x256xf32> to vector<16x128xf32>
    %169 = math.exp %168 : vector<16x128xf32>
    %170 = arith.mulf %169, %0 : vector<16x128xf32>
    %171 = arith.addf %167, %170 : vector<16x128xf32>
    %172 = arith.truncf %171 : vector<16x128xf32> to vector<16x128xbf16>
    %c0_94 = arith.constant 0 : index
    %c0_95 = arith.constant 0 : index
    %173 = vector.load %arg2[%c0_94, %c0_95] : memref<128x128xbf16, #tpu.memory_space<vmem>>, vector<128x128xbf16>
    %cst_96 = arith.constant dense<0.000000e+00> : vector<16x128xf32>
    %174 = tpu.matmul %172, %173, %cst_96 {dimension_numbers = #tpu.dot_dimension_numbers<[1], [0], [0], [1], [0, 0, 1, 1], [], []>} : vector<16x128xbf16>, vector<128x128xbf16>, vector<16x128xf32> -> vector<16x128xf32>
    %175 = vector.broadcast %1 : vector<1x128xf32> to vector<16x128xf32>
    %176 = arith.addf %174, %175 : vector<16x128xf32>
    %cst_97 = arith.constant 0.000000e+00 : f32
    %177 = vector.broadcast %cst_97 : f32 to vector<16x128xf32>
    %178 = arith.maximumf %176, %177 : vector<16x128xf32>
    %179 = arith.truncf %178 : vector<16x128xf32> to vector<16x128xbf16>
    %c0_98 = arith.constant 0 : index
    %c0_99 = arith.constant 0 : index
    %c0_100 = arith.constant 0 : index
    %180 = vector.load %arg4[%c0_98, %c0_99, %c0_100] : memref<2x128x128xbf16, #tpu.memory_space<vmem>>, vector<1x128x128xbf16>
    %181 = vector.shape_cast %180 : vector<1x128x128xbf16> to vector<128x128xbf16>
    %cst_101 = arith.constant dense<0.000000e+00> : vector<16x128xf32>
    %182 = tpu.matmul %179, %181, %cst_101 {dimension_numbers = #tpu.dot_dimension_numbers<[1], [0], [0], [1], [0, 0, 1, 1], [], []>} : vector<16x128xbf16>, vector<128x128xbf16>, vector<16x128xf32> -> vector<16x128xf32>
    %183 = vector.broadcast %3 : vector<1x128xf32> to vector<16x128xf32>
    %184 = arith.addf %182, %183 : vector<16x128xf32>
    %cst_102 = arith.constant 0.000000e+00 : f32
    %185 = vector.broadcast %cst_102 : f32 to vector<16x128xf32>
    %186 = arith.maximumf %184, %185 : vector<16x128xf32>
    %187 = arith.truncf %186 : vector<16x128xf32> to vector<16x128xbf16>
    %c1_103 = arith.constant 1 : index
    %c0_104 = arith.constant 0 : index
    %c0_105 = arith.constant 0 : index
    %188 = vector.load %arg4[%c1_103, %c0_104, %c0_105] : memref<2x128x128xbf16, #tpu.memory_space<vmem>>, vector<1x128x128xbf16>
    %189 = vector.shape_cast %188 : vector<1x128x128xbf16> to vector<128x128xbf16>
    %cst_106 = arith.constant dense<0.000000e+00> : vector<16x128xf32>
    %190 = tpu.matmul %187, %189, %cst_106 {dimension_numbers = #tpu.dot_dimension_numbers<[1], [0], [0], [1], [0, 0, 1, 1], [], []>} : vector<16x128xbf16>, vector<128x128xbf16>, vector<16x128xf32> -> vector<16x128xf32>
    %191 = vector.broadcast %5 : vector<1x128xf32> to vector<16x128xf32>
    %192 = arith.addf %190, %191 : vector<16x128xf32>
    %cst_107 = arith.constant 0.000000e+00 : f32
    %193 = vector.broadcast %cst_107 : f32 to vector<16x128xf32>
    %194 = arith.maximumf %192, %193 : vector<16x128xf32>
    %195 = arith.truncf %194 : vector<16x128xf32> to vector<16x128xbf16>
    %c0_108 = arith.constant 0 : index
    %c0_109 = arith.constant 0 : index
    %196 = vector.load %arg6[%c0_108, %c0_109] : memref<128x256xbf16, #tpu.memory_space<vmem>>, vector<128x256xbf16>
    %cst_110 = arith.constant dense<0.000000e+00> : vector<16x256xf32>
    %197 = tpu.matmul %195, %196, %cst_110 {dimension_numbers = #tpu.dot_dimension_numbers<[1], [0], [0], [1], [0, 0, 1, 1], [], []>} : vector<16x128xbf16>, vector<128x256xbf16>, vector<16x256xf32> -> vector<16x256xf32>
    %198 = vector.broadcast %6 : vector<1x256xf32> to vector<16x256xf32>
    %199 = arith.addf %197, %198 : vector<16x256xf32>
    %200 = vector.extract_strided_slice %199 {offsets = [0, 0], sizes = [16, 128], strides = [1, 1]} : vector<16x256xf32> to vector<16x128xf32>
    %201 = vector.extract_strided_slice %199 {offsets = [0, 128], sizes = [16, 128], strides = [1, 1]} : vector<16x256xf32> to vector<16x128xf32>
    %202 = math.exp %201 : vector<16x128xf32>
    %203 = arith.mulf %202, %0 : vector<16x128xf32>
    %204 = arith.addf %200, %203 : vector<16x128xf32>
    %205 = arith.truncf %204 : vector<16x128xf32> to vector<16x128xbf16>
    %c0_111 = arith.constant 0 : index
    %c0_112 = arith.constant 0 : index
    %206 = vector.load %arg2[%c0_111, %c0_112] : memref<128x128xbf16, #tpu.memory_space<vmem>>, vector<128x128xbf16>
    %cst_113 = arith.constant dense<0.000000e+00> : vector<16x128xf32>
    %207 = tpu.matmul %205, %206, %cst_113 {dimension_numbers = #tpu.dot_dimension_numbers<[1], [0], [0], [1], [0, 0, 1, 1], [], []>} : vector<16x128xbf16>, vector<128x128xbf16>, vector<16x128xf32> -> vector<16x128xf32>
    %208 = vector.broadcast %1 : vector<1x128xf32> to vector<16x128xf32>
    %209 = arith.addf %207, %208 : vector<16x128xf32>
    %cst_114 = arith.constant 0.000000e+00 : f32
    %210 = vector.broadcast %cst_114 : f32 to vector<16x128xf32>
    %211 = arith.maximumf %209, %210 : vector<16x128xf32>
    %212 = arith.truncf %211 : vector<16x128xf32> to vector<16x128xbf16>
    %c0_115 = arith.constant 0 : index
    %c0_116 = arith.constant 0 : index
    %c0_117 = arith.constant 0 : index
    %213 = vector.load %arg4[%c0_115, %c0_116, %c0_117] : memref<2x128x128xbf16, #tpu.memory_space<vmem>>, vector<1x128x128xbf16>
    %214 = vector.shape_cast %213 : vector<1x128x128xbf16> to vector<128x128xbf16>
    %cst_118 = arith.constant dense<0.000000e+00> : vector<16x128xf32>
    %215 = tpu.matmul %212, %214, %cst_118 {dimension_numbers = #tpu.dot_dimension_numbers<[1], [0], [0], [1], [0, 0, 1, 1], [], []>} : vector<16x128xbf16>, vector<128x128xbf16>, vector<16x128xf32> -> vector<16x128xf32>
    %216 = vector.broadcast %3 : vector<1x128xf32> to vector<16x128xf32>
    %217 = arith.addf %215, %216 : vector<16x128xf32>
    %cst_119 = arith.constant 0.000000e+00 : f32
    %218 = vector.broadcast %cst_119 : f32 to vector<16x128xf32>
    %219 = arith.maximumf %217, %218 : vector<16x128xf32>
    %220 = arith.truncf %219 : vector<16x128xf32> to vector<16x128xbf16>
    %c1_120 = arith.constant 1 : index
    %c0_121 = arith.constant 0 : index
    %c0_122 = arith.constant 0 : index
    %221 = vector.load %arg4[%c1_120, %c0_121, %c0_122] : memref<2x128x128xbf16, #tpu.memory_space<vmem>>, vector<1x128x128xbf16>
    %222 = vector.shape_cast %221 : vector<1x128x128xbf16> to vector<128x128xbf16>
    %cst_123 = arith.constant dense<0.000000e+00> : vector<16x128xf32>
    %223 = tpu.matmul %220, %222, %cst_123 {dimension_numbers = #tpu.dot_dimension_numbers<[1], [0], [0], [1], [0, 0, 1, 1], [], []>} : vector<16x128xbf16>, vector<128x128xbf16>, vector<16x128xf32> -> vector<16x128xf32>
    %224 = vector.broadcast %5 : vector<1x128xf32> to vector<16x128xf32>
    %225 = arith.addf %223, %224 : vector<16x128xf32>
    %cst_124 = arith.constant 0.000000e+00 : f32
    %226 = vector.broadcast %cst_124 : f32 to vector<16x128xf32>
    %227 = arith.maximumf %225, %226 : vector<16x128xf32>
    %228 = arith.truncf %227 : vector<16x128xf32> to vector<16x128xbf16>
    %c0_125 = arith.constant 0 : index
    %c0_126 = arith.constant 0 : index
    %229 = vector.load %arg6[%c0_125, %c0_126] : memref<128x256xbf16, #tpu.memory_space<vmem>>, vector<128x256xbf16>
    %cst_127 = arith.constant dense<0.000000e+00> : vector<16x256xf32>
    %230 = tpu.matmul %228, %229, %cst_127 {dimension_numbers = #tpu.dot_dimension_numbers<[1], [0], [0], [1], [0, 0, 1, 1], [], []>} : vector<16x128xbf16>, vector<128x256xbf16>, vector<16x256xf32> -> vector<16x256xf32>
    %231 = vector.broadcast %6 : vector<1x256xf32> to vector<16x256xf32>
    %232 = arith.addf %230, %231 : vector<16x256xf32>
    %233 = vector.extract_strided_slice %232 {offsets = [0, 0], sizes = [16, 128], strides = [1, 1]} : vector<16x256xf32> to vector<16x128xf32>
    %234 = vector.extract_strided_slice %232 {offsets = [0, 128], sizes = [16, 128], strides = [1, 1]} : vector<16x256xf32> to vector<16x128xf32>
    %235 = math.exp %234 : vector<16x128xf32>
    %236 = arith.mulf %235, %0 : vector<16x128xf32>
    %237 = arith.addf %233, %236 : vector<16x128xf32>
    %238 = arith.truncf %237 : vector<16x128xf32> to vector<16x128xbf16>
    %c0_128 = arith.constant 0 : index
    %c0_129 = arith.constant 0 : index
    %239 = vector.load %arg2[%c0_128, %c0_129] : memref<128x128xbf16, #tpu.memory_space<vmem>>, vector<128x128xbf16>
    %cst_130 = arith.constant dense<0.000000e+00> : vector<16x128xf32>
    %240 = tpu.matmul %238, %239, %cst_130 {dimension_numbers = #tpu.dot_dimension_numbers<[1], [0], [0], [1], [0, 0, 1, 1], [], []>} : vector<16x128xbf16>, vector<128x128xbf16>, vector<16x128xf32> -> vector<16x128xf32>
    %241 = vector.broadcast %1 : vector<1x128xf32> to vector<16x128xf32>
    %242 = arith.addf %240, %241 : vector<16x128xf32>
    %cst_131 = arith.constant 0.000000e+00 : f32
    %243 = vector.broadcast %cst_131 : f32 to vector<16x128xf32>
    %244 = arith.maximumf %242, %243 : vector<16x128xf32>
    %245 = arith.truncf %244 : vector<16x128xf32> to vector<16x128xbf16>
    %c0_132 = arith.constant 0 : index
    %c0_133 = arith.constant 0 : index
    %c0_134 = arith.constant 0 : index
    %246 = vector.load %arg4[%c0_132, %c0_133, %c0_134] : memref<2x128x128xbf16, #tpu.memory_space<vmem>>, vector<1x128x128xbf16>
    %247 = vector.shape_cast %246 : vector<1x128x128xbf16> to vector<128x128xbf16>
    %cst_135 = arith.constant dense<0.000000e+00> : vector<16x128xf32>
    %248 = tpu.matmul %245, %247, %cst_135 {dimension_numbers = #tpu.dot_dimension_numbers<[1], [0], [0], [1], [0, 0, 1, 1], [], []>} : vector<16x128xbf16>, vector<128x128xbf16>, vector<16x128xf32> -> vector<16x128xf32>
    %249 = vector.broadcast %3 : vector<1x128xf32> to vector<16x128xf32>
    %250 = arith.addf %248, %249 : vector<16x128xf32>
    %cst_136 = arith.constant 0.000000e+00 : f32
    %251 = vector.broadcast %cst_136 : f32 to vector<16x128xf32>
    %252 = arith.maximumf %250, %251 : vector<16x128xf32>
    %253 = arith.truncf %252 : vector<16x128xf32> to vector<16x128xbf16>
    %c1_137 = arith.constant 1 : index
    %c0_138 = arith.constant 0 : index
    %c0_139 = arith.constant 0 : index
    %254 = vector.load %arg4[%c1_137, %c0_138, %c0_139] : memref<2x128x128xbf16, #tpu.memory_space<vmem>>, vector<1x128x128xbf16>
    %255 = vector.shape_cast %254 : vector<1x128x128xbf16> to vector<128x128xbf16>
    %cst_140 = arith.constant dense<0.000000e+00> : vector<16x128xf32>
    %256 = tpu.matmul %253, %255, %cst_140 {dimension_numbers = #tpu.dot_dimension_numbers<[1], [0], [0], [1], [0, 0, 1, 1], [], []>} : vector<16x128xbf16>, vector<128x128xbf16>, vector<16x128xf32> -> vector<16x128xf32>
    %257 = vector.broadcast %5 : vector<1x128xf32> to vector<16x128xf32>
    %258 = arith.addf %256, %257 : vector<16x128xf32>
    %cst_141 = arith.constant 0.000000e+00 : f32
    %259 = vector.broadcast %cst_141 : f32 to vector<16x128xf32>
    %260 = arith.maximumf %258, %259 : vector<16x128xf32>
    %261 = arith.truncf %260 : vector<16x128xf32> to vector<16x128xbf16>
    %c0_142 = arith.constant 0 : index
    %c0_143 = arith.constant 0 : index
    %262 = vector.load %arg6[%c0_142, %c0_143] : memref<128x256xbf16, #tpu.memory_space<vmem>>, vector<128x256xbf16>
    %cst_144 = arith.constant dense<0.000000e+00> : vector<16x256xf32>
    %263 = tpu.matmul %261, %262, %cst_144 {dimension_numbers = #tpu.dot_dimension_numbers<[1], [0], [0], [1], [0, 0, 1, 1], [], []>} : vector<16x128xbf16>, vector<128x256xbf16>, vector<16x256xf32> -> vector<16x256xf32>
    %264 = vector.broadcast %6 : vector<1x256xf32> to vector<16x256xf32>
    %265 = arith.addf %263, %264 : vector<16x256xf32>
    %266 = vector.extract_strided_slice %265 {offsets = [0, 0], sizes = [16, 128], strides = [1, 1]} : vector<16x256xf32> to vector<16x128xf32>
    %267 = vector.extract_strided_slice %265 {offsets = [0, 128], sizes = [16, 128], strides = [1, 1]} : vector<16x256xf32> to vector<16x128xf32>
    %268 = math.exp %267 : vector<16x128xf32>
    %269 = arith.mulf %268, %0 : vector<16x128xf32>
    %270 = arith.addf %266, %269 : vector<16x128xf32>
    %c0_145 = arith.constant 0 : index
    %c0_146 = arith.constant 0 : index
    %271 = vector.load %arg8[%c0_145, %c0_146] : memref<16x128xf32, #tpu.memory_space<vmem>>, vector<16x128xf32>
    tpu.vector_store %arg8[%c0_145, %c0_146], %270 {strides = array<i32>} : memref<16x128xf32, #tpu.memory_space<vmem>>, vector<16x128xf32>,
    %cst_147 = arith.constant dense<0.000000e+00> : vector<16xf32>
    %272 = vector.multi_reduction <add>, %267, %cst_147 [1] : vector<16x128xf32> to vector<16xf32>
    %273 = vector.shape_cast %272 : vector<16xf32> to vector<16x1xf32>
    %cst_148 = arith.constant 0.000000e+00 : f32
    %274 = vector.broadcast %cst_148 : f32 to vector<16x1xf32>
    %275 = arith.subf %274, %273 : vector<16x1xf32>
    %276 = vector.shape_cast %275 : vector<16x1xf32> to vector<16x1xf32>
    %277 = vector.broadcast %276 : vector<16x1xf32> to vector<16x128xf32>
    %c0_149 = arith.constant 0 : index
    %c0_150 = arith.constant 0 : index
    %278 = vector.load %arg9[%c0_149, %c0_150] : memref<16x128xf32, #tpu.memory_space<vmem>>, vector<16x128xf32>
    tpu.vector_store %arg9[%c0_149, %c0_150], %277 {strides = array<i32>} : memref<16x128xf32, #tpu.memory_space<vmem>>, vector<16x128xf32>,
    return
  }
  func.func @transform_0(%arg0: i32) -> (i32, i32) {
    %c0_i32 = arith.constant 0 : i32
    %c0_i32_0 = arith.constant 0 : i32
    return %arg0, %c0_i32 : i32, i32
  }
  func.func @transform_1(%arg0: i32) -> (i32, i32) {
    %c0_i32 = arith.constant 0 : i32
    %c0_i32_0 = arith.constant 0 : i32
    %c0_i32_1 = arith.constant 0 : i32
    return %c0_i32, %c0_i32_0 : i32, i32
  }
  func.func @transform_2(%arg0: i32) -> (i32, i32) {
    %c0_i32 = arith.constant 0 : i32
    %c0_i32_0 = arith.constant 0 : i32
    %c0_i32_1 = arith.constant 0 : i32
    return %c0_i32, %c0_i32_0 : i32, i32
  }
  func.func @transform_3(%arg0: i32) -> (i32, i32, i32) {
    %c0_i32 = arith.constant 0 : i32
    %c0_i32_0 = arith.constant 0 : i32
    %c0_i32_1 = arith.constant 0 : i32
    %c0_i32_2 = arith.constant 0 : i32
    return %c0_i32, %c0_i32_0, %c0_i32_1 : i32, i32, i32
  }
  func.func @transform_4(%arg0: i32) -> (i32, i32, i32) {
    %c0_i32 = arith.constant 0 : i32
    %c0_i32_0 = arith.constant 0 : i32
    %c0_i32_1 = arith.constant 0 : i32
    %c0_i32_2 = arith.constant 0 : i32
    return %c0_i32, %c0_i32_0, %c0_i32_1 : i32, i32, i32
  }
  func.func @transform_5(%arg0: i32) -> (i32, i32) {
    %c0_i32 = arith.constant 0 : i32
    %c0_i32_0 = arith.constant 0 : i32
    %c0_i32_1 = arith.constant 0 : i32
    return %c0_i32, %c0_i32_0 : i32, i32
  }
  func.func @transform_6(%arg0: i32) -> (i32, i32) {
    %c0_i32 = arith.constant 0 : i32
    %c0_i32_0 = arith.constant 0 : i32
    %c0_i32_1 = arith.constant 0 : i32
    return %c0_i32, %c0_i32_0 : i32, i32
  }
  func.func @transform_7(%arg0: i32) -> (i32, i32) {
    %c0_i32 = arith.constant 0 : i32
    %c0_i32_0 = arith.constant 0 : i32
    return %arg0, %c0_i32 : i32, i32
  }
  func.func @transform_8(%arg0: i32) -> (i32, i32) {
    %c0_i32 = arith.constant 0 : i32
    %c0_i32_0 = arith.constant 0 : i32
    return %arg0, %c0_i32 : i32, i32
  }
}

</mosaic_0001>

<bundles_post_ra>
// kernel: tpu_custom_call.1
= control target key start
LH: loop header
LB: loop body
LE: loop exit
PB: predicated region body
PF: predicated region fallthrough
CT: control target
= control target key end

     0   :  { %14 = vsyncpa [#allocation3], 0  ;;  %s2247_s0 = inlined_call_operand.hbm [shape: f32[16,128], index: 0, kind: input, shape index: {}]   ;;  %s2248_s1 = inlined_call_operand.hbm [shape: bf16[128,128], index: 1, kind: input, shape index: {}]   ;;  %s2249_s2 = inlined_call_operand.hbm [shape: f32[1,128], index: 2, kind: input, shape index: {}]   ;;  %s2250_s3 = inlined_call_operand.hbm [shape: bf16[2,128,128], index: 3, kind: input, shape index: {}]   ;;  %s2251_s4 = inlined_call_operand.vmem [shape: f32[2,1,128], index: 4, kind: input, shape index: {}]   ;;  %s2252_s5 = inlined_call_operand.hbm [shape: bf16[128,256], index: 5, kind: input, shape index: {}]   ;;  %s2253_s6 = inlined_call_operand.vmem [shape: f32[1,256], index: 6, kind: input, shape index: {}]   ;;  %s2254_s7 = inlined_call_operand.hbm [shape: f32[16,128], index: 7, kind: output, shape index: {0}]   ;;  %s2255_s8 = inlined_call_operand.hbm [shape: f32[16,128], index: 8, kind: output, shape index: {1}]  }
   0x1   :  { %15 = vsyncpa [#allocation6], 0 }
   0x2   :  { %16 = vsyncpa [#allocation9], 0 }
   0x3   :  { %17 = vsyncpa [#allocation4], 0  ;;  %s36_s29 = sshll.u32 %s2248_s1, 4  ;;  %s37_s29 = int_to_ptr.hbm [resolvable:$true] %s36_s29 }
   0x4   :  { %18 = vsyncpa [#allocation13], 0  ;;  %s1623_s30 = smov [#allocation5]   ;;  %s60_s12 = sshll.u32 %s2250_s3, 4  ;;  %s61_s12 = int_to_ptr.hbm [resolvable:$true] %s60_s12 }
   0x5   :  { %s38_s9 = sshll.u32 %s1623_s30, 4  ;;  %s1624_s13 = smov 64   ;;  %s39_s9 = int_to_ptr.vmem [resolvable:$true] %s38_s9 }
   0x6   :  { %s1625_s14 = smov 4   ;;  %s1626_s15 = smov [#allocation8]  }
   0x7   :  { %44 = dma.hbm_to_vmem [thread:$0]  %s37_s29, 1024, %s39_s9, [#allocation6], %s1624_s13, %s1624_s13, %s1625_s14  }
   0x8   :  { %s62_s16 = sshll.u32 %s1626_s15, 4  ;;  %s23_s19 = sshll.u32 %s2247_s0, 4  ;;  %s63_s16 = int_to_ptr.vmem [resolvable:$true] %s62_s16  ;;  %s24_s19 = int_to_ptr.hbm [resolvable:$true] %s23_s19 }
   0x9   :  { %68 = dma.hbm_to_vmem [thread:$0]  %s61_s12, 2048, %s63_s16, [#allocation9], %s1624_s13, %s1624_s13, %s1625_s14  }
   0xa   :  { %s1627_s1 = smov [#allocation2]   ;;  %s50_s3 = sshll.u32 %s2249_s2, 4  ;;  %s51_s3 = int_to_ptr.hbm [resolvable:$true] %s50_s3 }
   0xb   :  { %s25_s20 = sshll.u32 %s1627_s1, 4  ;;  %s1628_s23 = smov 128   ;;  %s26_s20 = int_to_ptr.vmem [resolvable:$true] %s25_s20 }
   0xc   :  { %s1629_s24 = smov 8   ;;  %s1630_s25 = smov [#allocation7]  }
   0xd   :  { %31 = dma.hbm_to_vmem [thread:$0]  %s24_s19, 256, %s26_s20, [#allocation3], %s1628_s23, %s1628_s23, %s1629_s24  }
   0xe   :  { %s52_s26 = sshll.u32 %s1630_s25, 4  ;;  %s75_s28 = sshll.u32 %s2252_s5, 4  ;;  %s53_s26 = int_to_ptr.vmem [resolvable:$true] %s52_s26  ;;  %s76_s28 = int_to_ptr.hbm [resolvable:$true] %s75_s28 }
   0xf   :  { %55 = dma.hbm_to_vmem [thread:$0]  %s51_s3, 16, %s53_s26, [#allocation6]  }
  0x10   :  { %s1631_s29 = smov [#allocation10]  }
  0x11   :  { %s77_s30 = sshll.u32 %s1631_s29, 4  ;;  %s78_s30 = int_to_ptr.vmem [resolvable:$true] %s77_s30 }
  0x12   :  { %83 = dma.hbm_to_vmem [thread:$0]  %s76_s28, 2048, %s78_s30, [#allocation9], %s1628_s23, %s1628_s23, %s1629_s24  }
  0x13   :  { %1613 = dma.done.wait [#allocation3], 256  }
  0x14   :  { %1614 = vsyncadd [#allocation3], 4294967040 }
  0x15   :  { %1615 = dma.done.wait [#allocation6], 1040  }
  0x16   :  { %1616 = vsyncadd [#allocation6], 4294966256 }
  0x17   :  { %1617 = dma.done.wait [#allocation9], 4096  }
  0x18   :  { %1618 = vsyncadd [#allocation9], 4294963200  ;;  %v1700_v0 = vld [vmem:[#allocation5 + $0x38] sm:$0xff]  ;;  %v1703_v1 = vld [vmem:[#allocation5 + $0x30] sm:$0xff]  ;;  %s1136_s19 = sshll.u32 %s2254_s7, 4  ;;  %s1633_s1 = smov [#allocation12]   ;;  %s1137_s19 = int_to_ptr.hbm [resolvable:$true] %s1136_s19 }
  0x19   :  { %181 = vmatpush.bf16.msra.mxu0 %v1700_v0  ;;  %v1705_v2 = vld [vmem:[#allocation8 + $0x38] sm:$0xff]  ;;  %v1708_v3 = vld [vmem:[#allocation8 + $0x30] sm:$0xff]  ;;  %v1711_v4 = vld [vmem:[#allocation5 + $0x28] sm:$0xff]  ;;  %s1147_s20 = sshll.u32 %s1633_s1, 4  ;;  %s1149_s7 = sshll.u32 %s2255_s8, 4  ;;  %s1148_s20 = int_to_ptr.vmem [resolvable:$true] %s1147_s20  ;;  %s1150_s7 = int_to_ptr.hbm [resolvable:$true] %s1149_s7 }
  0x1a   :  { %265 = vmatpush.bf16.msra.mxu1 %v1705_v2  ;;  %v1714_v5 = vld [vmem:[#allocation8 + $0x28] sm:$0xff]  ;;  %v1717_v6 = vld [vmem:[#allocation5 + $0x20] sm:$0xff]  ;;  %v1723_v8 = vld [vmem:[#allocation5 + $0x18] sm:$0xff] }
  0x1b   :  { %v1720_v7 = vld [vmem:[#allocation8 + $0x20] sm:$0xff]  ;;  %v1727_v9 = vld [vmem:[#allocation5 + $0x10] sm:$0xff]  ;;  %v1737_v13 = vld [vmem:[#allocation2 + $0x8] sm:$0xff] }
  0x1c   :  { %v1730_v10 = vld [vmem:[#allocation5 + $0x8] sm:$0xff]  ;;  %v1733_v11 = vld [vmem:[#allocation5] sm:$0xff]  ;;  %v1735_v12 = vld [vmem:[#allocation2] sm:$0xff] }
  0x1d   :  { %182 = vmatpush.bf16.msra.mxu0 %v1703_v1  ;;  %v113_v14 = vpack.c.bf16 %v1737_v13, %v1735_v12  ;;  %v1742_v15 = vld [vmem:[#allocation8 + $0x18] sm:$0xff]  ;;  %v1745_v16 = vld [vmem:[#allocation8 + $0x10] sm:$0xff]  ;;  %v1748_v17 = vld [vmem:[#allocation8 + $0x8] sm:$0xff] }
  0x1e   :  { %266 = vmatpush.bf16.msra.mxu1 %v1708_v3  ;;  %v1751_v18 = vld [vmem:[#allocation8] sm:$0xff]  ;;  %v1755_v19 = vld [vmem:[#allocation8 + $0x78] sm:$0xff]  ;;  %v1758_v20 = vld [vmem:[#allocation8 + $0x70] sm:$0xff] }
  0x1f   :  { %350 = vmatpush.bf16.msra.mxu2 %v1755_v19  ;;  %v1762_v21 = vld [vmem:[#allocation8 + $0x68] sm:$0xff]  ;;  %v1766_v22 = vld [vmem:[#allocation8 + $0x60] sm:$0xff]  ;;  %v1772_v24 = vld [vmem:[#allocation7] ss:$0 sm:$0xff] }
  0x20   :  { %v1778_v31 = vld [vmem:[#allocation8 + $0x58] sm:$0xff]  ;;  %v1781_v32 = vld [vmem:[#allocation8 + $0x50] sm:$0xff]  ;;  %v1784_v33 = vld [vmem:[#allocation8 + $0x48] sm:$0xff] }
  0x21   :  { %183 = vmatpush.bf16.msra.mxu0 %v1711_v4  ;;  %v1787_v34 = vld [vmem:[#allocation8 + $0x40] sm:$0xff]  ;;  %v1324_v35 = vld [vmem:[#allocation10 + $0x70] sm:$0xf]  ;;  %v1369_v36 = vld [vmem:[#allocation10 + $0x74] sm:$0xf0] }
  0x22   :  { %267 = vmatpush.bf16.msra.mxu1 %v1714_v5  ;;  %v1368_v37 = vld [vmem:[#allocation10 + $0x74] sm:$0xf]  ;;  %v1791_v38 = vor.u32 %v1369_v36, %v1324_v35  ;;  %v1326_v39 = vld [vmem:[#allocation10 + $0x78] sm:$0xf0]  ;;  %v1316_v40 = vld [vmem:[#allocation10 + $0x60] sm:$0xf] }
  0x23   :  { %351 = vmatpush.bf16.msra.mxu2 %v1758_v20  ;;  %v1367_v41 = vld [vmem:[#allocation10 + $0x64] sm:$0xf0]  ;;  %v1793_v42 = vor.u32 %v1368_v37, %v1326_v39  ;;  %v1366_v43 = vld [vmem:[#allocation10 + $0x64] sm:$0xf]  ;;  %v1318_v44 = vld [vmem:[#allocation10 + $0x68] sm:$0xf0] }
  0x24   :  { %468 = vmatpush.bf16.msra.mxu3 %v1791_v38  ;;  %v1797_v45 = vor.u32 %v1367_v41, %v1316_v40  ;;  %v1800_v46 = vor.u32 %v1366_v43, %v1318_v44  ;;  %v1308_v47 = vld [vmem:[#allocation10 + $0x50] sm:$0xf]  ;;  %v1365_v48 = vld [vmem:[#allocation10 + $0x54] sm:$0xf0]  ;;  %v1364_v49 = vld [vmem:[#allocation10 + $0x54] sm:$0xf] }
  0x25   :  { %184 = vmatpush.bf16.msra.mxu0 %v1717_v6  ;;  %v1310_v50 = vld [vmem:[#allocation10 + $0x58] sm:$0xf0]  ;;  %v1805_v51 = vor.u32 %v1365_v48, %v1308_v47  ;;  %v1300_v53 = vld [vmem:[#allocation10 + $0x40] sm:$0xf]  ;;  %v1363_v54 = vld [vmem:[#allocation10 + $0x44] sm:$0xf0] }
  0x26   :  { %268 = vmatpush.bf16.msra.mxu1 %v1720_v7  ;;  %v1808_v52 = vor.u32 %v1364_v49, %v1310_v50  ;;  %v1362_v55 = vld [vmem:[#allocation10 + $0x44] sm:$0xf]  ;;  %v1302_v56 = vld [vmem:[#allocation10 + $0x48] sm:$0xf0]  ;;  %v1813_v57 = vor.u32 %v1363_v54, %v1300_v53  ;;  %v1284_v36 = vld [vmem:[#allocation10 + $0x20] sm:$0xf] }
  0x27   :  { %352 = vmatpush.bf16.msra.mxu2 %v1762_v21  ;;  %v1816_v58 = vor.u32 %v1362_v55, %v1302_v56  ;;  %v1827_v60 = vld [vmem:[%s2251_s4] ss:$0 sm:$0xff]  ;;  %v1359_v37 = vld [vmem:[#allocation10 + $0x24] sm:$0xf0]  ;;  %v1358_v39 = vld [vmem:[#allocation10 + $0x24] sm:$0xf] }
  0x28   :  { %469 = vmatpush.bf16.msra.mxu3 %v1797_v45  ;;  %v1848_v40 = vor.u32 %v1359_v37, %v1284_v36  ;;  %v1286_v41 = vld [vmem:[#allocation10 + $0x28] sm:$0xf0]  ;;  %v1276_v44 = vld [vmem:[#allocation10 + $0x10] sm:$0xf]  ;;  %v1357_v47 = vld [vmem:[#allocation10 + $0x14] sm:$0xf0] }
  0x29   :  { %185 = vmatpush.bf16.msra.mxu0 %v1723_v8  ;;  %v1850_v43 = vor.u32 %v1358_v39, %v1286_v41  ;;  %v1356_v48 = vld [vmem:[#allocation10 + $0x14] sm:$0xf]  ;;  %v1855_v49 = vor.u32 %v1357_v47, %v1276_v44  ;;  %v1278_v50 = vld [vmem:[#allocation10 + $0x18] sm:$0xf0]  ;;  %v1268_v54 = vld [vmem:[#allocation10] sm:$0xf] }
  0x2a   :  { %269 = vmatpush.bf16.msra.mxu1 %v1742_v15  ;;  %v1857_v53 = vor.u32 %v1356_v48, %v1278_v50  ;;  %v1355_v55 = vld [vmem:[#allocation10 + $0x4] sm:$0xf0]  ;;  %v1354_v56 = vld [vmem:[#allocation10 + $0x4] sm:$0xf]  ;;  %v112_v36 = vld [vmem:[%s2253_s6] sm:$0x3] }
  0x2b   :  { %353 = vmatpush.bf16.msra.mxu2 %v1766_v22  ;;  %v1911_v37 = vperm.slane %v112_v36, 1 }
  0x2c   :  { %470 = vmatpush.bf16.msra.mxu3 %v1805_v51 }
  0x2d   :  { %186 = vmatpush.bf16.msra.mxu0 %v1727_v9 }
  0x2e   :  { %270 = vmatpush.bf16.msra.mxu1 %v1745_v16 }
  0x2f   :  { %354 = vmatpush.bf16.msra.mxu2 %v1778_v31 }
  0x30   :  { %471 = vmatpush.bf16.msra.mxu3 %v1813_v57 }
  0x31   :  { %187 = vmatpush.bf16.msra.mxu0 %v1730_v10 }
  0x32   :  { %271 = vmatpush.bf16.msra.mxu1 %v1748_v17 }
  0x33   :  { %355 = vmatpush.bf16.msra.mxu2 %v1781_v32 }
  0x35   :  { %188 = vmatpush.bf16.msra.mxu0 %v1733_v11 }
  0x36   :  { %272 = vmatpush.bf16.msra.mxu1 %v1751_v18 }
  0x37   :  { %356 = vmatpush.bf16.msra.mxu2 %v1784_v33 }
  0x38   :  { %189 = vmatmul.bf16.vlgmr.msra.gmra.mxu0 %v113_v14 }
  0x39   :  { %482 = vmatpush.bf16.msrb.mxu0 %v1793_v42 }
  0x3a   :  { %505 = vmatpush.bf16.msrb.mxu1 %v1700_v0 }
  0x3b   :  { %357 = vmatpush.bf16.msra.mxu2 %v1787_v34 }
  0x3d   :  { %483 = vmatpush.bf16.msrb.mxu0 %v1800_v46 }
  0x3e   :  { %506 = vmatpush.bf16.msrb.mxu1 %v1703_v1 }
  0x3f   :  { %522 = vmatpush.bf16.msrb.mxu2 %v1705_v2 }
  0x41   :  { %484 = vmatpush.bf16.msrb.mxu0 %v1808_v52 }
  0x42   :  { %507 = vmatpush.bf16.msrb.mxu1 %v1711_v4 }
  0x43   :  { %523 = vmatpush.bf16.msrb.mxu2 %v1708_v3 }
  0x45   :  { %485 = vmatpush.bf16.msrb.mxu0 %v1816_v58 }
  0x46   :  { %508 = vmatpush.bf16.msrb.mxu1 %v1717_v6 }
  0x47   :  { %524 = vmatpush.bf16.msrb.mxu2 %v1714_v5 }
  0x4a   :  { %509 = vmatpush.bf16.msrb.mxu1 %v1723_v8 }
  0x4b   :  { %525 = vmatpush.bf16.msrb.mxu2 %v1720_v7 }
  0x4e   :  { %510 = vmatpush.bf16.msrb.mxu1 %v1727_v9 }
  0x4f   :  { %526 = vmatpush.bf16.msrb.mxu2 %v1742_v15 }
  0x52   :  { %511 = vmatpush.bf16.msrb.mxu1 %v1730_v10 }
  0x53   :  { %527 = vmatpush.bf16.msrb.mxu2 %v1745_v16 }
  0x56   :  { %512 = vmatpush.bf16.msrb.mxu1 %v1733_v11 }
  0x57   :  { %528 = vmatpush.bf16.msrb.mxu2 %v1748_v17 }
  0x5b   :  { %529 = vmatpush.bf16.msrb.mxu2 %v1751_v18 }
  0xb5   :  { %v190_v23 = vpop.f32.mrf.mxu0 }
  0xb6   :  { %v191_v25 = vadd.f32 %v1772_v24, %v190_v23 }
  0xb8   :  { %v195_v28 = vmax.f32 %v191_v25, 0.0 }
  0xbd   :  { %v192_v26 = vpop.f32.mrf.mxu0 }
  0xbe   :  { %v193_v27 = vadd.f32 %v1772_v24, %v192_v26  ;;  %v1292_v26 = vld [vmem:[#allocation10 + $0x30] sm:$0xf] }
  0xc0   :  { %v196_v29 = vmax.f32 %v193_v27, 0.0  ;;  %v1361_v27 = vld [vmem:[#allocation10 + $0x34] sm:$0xf0] }
  0xc2   :  { %v197_v30 = vpack.c.bf16 %v196_v29, %v195_v28  ;;  %v1360_v28 = vld [vmem:[#allocation10 + $0x34] sm:$0xf]  ;;  %v1841_v29 = vor.u32 %v1361_v27, %v1292_v26 }
  0xc4   :  { %273 = vmatmul.bf16.vlgmr.msra.gmra.mxu1 %v197_v30  ;;  %v1294_v30 = vld [vmem:[#allocation10 + $0x38] sm:$0xf0]  ;;  %472 = vmatpush.bf16.msra.mxu3 %v1841_v29 }
  0xc5   :  { %570 = vmatpush.bf16.msra.mxu1 %v1793_v42  ;;  %v1843_v35 = vor.u32 %v1360_v28, %v1294_v30 }
  0xc7   :  { %486 = vmatpush.bf16.msrb.mxu0 %v1843_v35 }
  0xc8   :  { %473 = vmatpush.bf16.msra.mxu3 %v1848_v40 }
  0xc9   :  { %571 = vmatpush.bf16.msra.mxu1 %v1800_v46 }
  0xcb   :  { %487 = vmatpush.bf16.msrb.mxu0 %v1850_v43 }
  0xcc   :  { %474 = vmatpush.bf16.msra.mxu3 %v1855_v49 }
  0xcd   :  { %572 = vmatpush.bf16.msra.mxu1 %v1808_v52 }
  0xcf   :  { %488 = vmatpush.bf16.msrb.mxu0 %v1857_v53 }
  0xd1   :  { %573 = vmatpush.bf16.msra.mxu1 %v1816_v58 }
  0xd5   :  { %574 = vmatpush.bf16.msra.mxu1 %v1843_v35 }
  0xd9   :  { %575 = vmatpush.bf16.msra.mxu1 %v1850_v43 }
  0xdd   :  { %576 = vmatpush.bf16.msra.mxu1 %v1857_v53 }
 0x141   :  { %v274_v59 = vpop.f32.mrf.mxu1 }
 0x142   :  { %v275_v61 = vadd.f32 %v1827_v60, %v274_v59  ;;  %v1862_v59 = vor.u32 %v1355_v55, %v1268_v54 }
 0x144   :  { %v279_v14 = vmax.f32 %v275_v61, 0.0  ;;  %v1270_v61 = vld [vmem:[#allocation10 + $0x8] sm:$0xf0]  ;;  %475 = vmatpush.bf16.msra.mxu3 %v1862_v59 }
 0x148   :  { %539 = vmatpush.bf16.msrb.mxu3 %v1755_v19 }
 0x149   :  { %v276_v62 = vpop.f32.mrf.mxu1 }
 0x14a   :  { %v277_v63 = vadd.f32 %v1827_v60, %v276_v62  ;;  %v1864_v62 = vor.u32 %v1354_v56, %v1270_v61  ;;  %v1915_v56 = vperm.slane %v112_v36, 0 }
 0x14c   :  { %v280_v23 = vmax.f32 %v277_v63, 0.0  ;;  %489 = vmatpush.bf16.msrb.mxu0 %v1864_v62  ;;  %577 = vmatpush.bf16.msra.mxu1 %v1864_v62 }
 0x14d   :  { %540 = vmatpush.bf16.msrb.mxu3 %v1758_v20 }
 0x14e   :  { %v281_v25 = vpack.c.bf16 %v280_v23, %v279_v14  ;;  %v1884_v14 = vld [vmem:[%s2251_s4 + $0x1] ss:$0 sm:$0xff] }
 0x150   :  { %358 = vmatmul.bf16.vlgmr.msra.gmra.mxu2 %v281_v25  ;;  %556 = vmatpush.bf16.msra.mxu0 %v1791_v38 }
 0x151   :  { %593 = vmatpush.bf16.msra.mxu2 %v1700_v0  ;;  %541 = vmatpush.bf16.msrb.mxu3 %v1762_v21 }
 0x154   :  { %557 = vmatpush.bf16.msra.mxu0 %v1797_v45 }
 0x155   :  { %594 = vmatpush.bf16.msra.mxu2 %v1703_v1  ;;  %542 = vmatpush.bf16.msrb.mxu3 %v1766_v22 }
 0x158   :  { %558 = vmatpush.bf16.msra.mxu0 %v1805_v51 }
 0x159   :  { %595 = vmatpush.bf16.msra.mxu2 %v1711_v4  ;;  %543 = vmatpush.bf16.msrb.mxu3 %v1778_v31 }
 0x15c   :  { %559 = vmatpush.bf16.msra.mxu0 %v1813_v57 }
 0x15d   :  { %596 = vmatpush.bf16.msra.mxu2 %v1717_v6  ;;  %544 = vmatpush.bf16.msrb.mxu3 %v1781_v32 }
 0x160   :  { %560 = vmatpush.bf16.msra.mxu0 %v1841_v29 }
 0x161   :  { %597 = vmatpush.bf16.msra.mxu2 %v1723_v8  ;;  %545 = vmatpush.bf16.msrb.mxu3 %v1784_v33 }
 0x164   :  { %561 = vmatpush.bf16.msra.mxu0 %v1848_v40 }
 0x165   :  { %598 = vmatpush.bf16.msra.mxu2 %v1727_v9  ;;  %546 = vmatpush.bf16.msrb.mxu3 %v1787_v34 }
 0x168   :  { %562 = vmatpush.bf16.msra.mxu0 %v1855_v49 }
 0x169   :  { %599 = vmatpush.bf16.msra.mxu2 %v1730_v10 }
 0x16c   :  { %563 = vmatpush.bf16.msra.mxu0 %v1862_v59 }
 0x16d   :  { %600 = vmatpush.bf16.msra.mxu2 %v1733_v11 }
 0x1d3   :  { %v359_v63 = vpop.f32.mrf.mxu2 }
 0x1d4   :  { %v360_v23 = vadd.f32 %v1884_v14, %v359_v63 }
 0x1d6   :  { %v364_v27 = vmax.f32 %v360_v23, 0.0 }
 0x1db   :  { %v361_v25 = vpop.f32.mrf.mxu2 }
 0x1dc   :  { %v362_v26 = vadd.f32 %v1884_v14, %v361_v25 }
 0x1de   :  { %v365_v28 = vmax.f32 %v362_v26, 0.0 }
 0x1e0   :  { %v366_v30 = vpack.c.bf16 %v365_v28, %v364_v27 }
 0x1e2   :  { %476 = vmatmul.bf16.vlgmr.msra.gmra.mxu3 %v366_v30  ;;  %490 = vmatmul.bf16.vlgmr.msrb.gmra.mxu0 %v366_v30 }
 0x1e3   :  { %610 = vmatpush.bf16.msra.mxu3 %v1705_v2  ;;  %627 = vmatpush.bf16.msrb.mxu0 %v1755_v19 }
 0x1e7   :  { %611 = vmatpush.bf16.msra.mxu3 %v1708_v3  ;;  %628 = vmatpush.bf16.msrb.mxu0 %v1758_v20 }
 0x1eb   :  { %612 = vmatpush.bf16.msra.mxu3 %v1714_v5  ;;  %629 = vmatpush.bf16.msrb.mxu0 %v1762_v21 }
 0x1ef   :  { %613 = vmatpush.bf16.msra.mxu3 %v1720_v7  ;;  %630 = vmatpush.bf16.msrb.mxu0 %v1766_v22 }
 0x1f3   :  { %614 = vmatpush.bf16.msra.mxu3 %v1742_v15  ;;  %631 = vmatpush.bf16.msrb.mxu0 %v1778_v31 }
 0x1f7   :  { %615 = vmatpush.bf16.msra.mxu3 %v1745_v16  ;;  %632 = vmatpush.bf16.msrb.mxu0 %v1781_v32 }
 0x1fb   :  { %616 = vmatpush.bf16.msra.mxu3 %v1748_v17  ;;  %633 = vmatpush.bf16.msrb.mxu0 %v1784_v33 }
 0x1ff   :  { %617 = vmatpush.bf16.msra.mxu3 %v1751_v18  ;;  %634 = vmatpush.bf16.msrb.mxu0 %v1787_v34 }
 0x25f   :  { %v491_v39 = vpop.f32.mrf.mxu0 }
 0x260   :  { %v492_v41 = vadd.f32 %v491_v39, %v1911_v37 }
 0x262   :  { %v496_v44 = vmul.f32 1.442695, %v492_v41 }
 0x264   :  { %1384 = vpow2.f32 %v496_v44 }
 0x265   :  { %v477_v47 = vpop.f32.mrf.mxu3 }
 0x266   :  { %v478_v25 = vadd.f32 %v477_v47, %v1915_v56 }
 0x267   :  { %v493_v48 = vpop.f32.mrf.mxu0 }
 0x268   :  { %v494_v50 = vadd.f32 %v493_v48, %v1911_v37 }
 0x26a   :  { %v498_v54 = vmul.f32 1.442695, %v494_v50  ;;  %v1385_v55 = vpop.eup %1384 }
 0x26b   :  { %v500_v63 = vmul.f32 %v1385_v55, %v1735_v12 }
 0x26c   :  { %1386 = vpow2.f32 %v498_v54 }
 0x26d   :  { %v479_v61 = vpop.f32.mrf.mxu3  ;;  %v502_v28 = vadd.f32 %v500_v63, %v478_v25 }
 0x26e   :  { %v480_v26 = vadd.f32 %v479_v61, %v1915_v56 }
 0x272   :  { %v1387_v23 = vpop.eup %1386 }
 0x273   :  { %v501_v27 = vmul.f32 %v1387_v23, %v1737_v13 }
 0x275   :  { %v503_v30 = vadd.f32 %v501_v27, %v480_v26 }
 0x277   :  { %v504_v39 = vpack.c.bf16 %v503_v30, %v502_v28 }
 0x279   :  { %513 = vmatmul.bf16.vlgmr.msrb.gmra.mxu1 %v504_v39 }
 0x27a   :  { %644 = vmatpush.bf16.msrb.mxu1 %v1791_v38 }
 0x27e   :  { %645 = vmatpush.bf16.msrb.mxu1 %v1797_v45 }
 0x282   :  { %646 = vmatpush.bf16.msrb.mxu1 %v1805_v51 }
 0x286   :  { %647 = vmatpush.bf16.msrb.mxu1 %v1813_v57 }
 0x28a   :  { %648 = vmatpush.bf16.msrb.mxu1 %v1841_v29 }
 0x28e   :  { %649 = vmatpush.bf16.msrb.mxu1 %v1848_v40 }
 0x292   :  { %650 = vmatpush.bf16.msrb.mxu1 %v1855_v49 }
 0x296   :  { %651 = vmatpush.bf16.msrb.mxu1 %v1862_v59 }
 0x2f6   :  { %v514_v36 = vpop.f32.mrf.mxu1 }
 0x2f7   :  { %v515_v41 = vadd.f32 %v1772_v24, %v514_v36 }
 0x2f9   :  { %v519_v48 = vmax.f32 %v515_v41, 0.0 }
 0x2fe   :  { %v516_v44 = vpop.f32.mrf.mxu1 }
 0x2ff   :  { %v517_v47 = vadd.f32 %v1772_v24, %v516_v44 }
 0x301   :  { %v520_v50 = vmax.f32 %v517_v47, 0.0 }
 0x303   :  { %v521_v54 = vpack.c.bf16 %v520_v50, %v519_v48 }
 0x305   :  { %530 = vmatmul.bf16.vlgmr.msrb.gmra.mxu2 %v521_v54 }
 0x306   :  { %658 = vmatpush.bf16.msrb.mxu2 %v1793_v42 }
 0x30a   :  { %659 = vmatpush.bf16.msrb.mxu2 %v1800_v46 }
 0x30e   :  { %660 = vmatpush.bf16.msrb.mxu2 %v1808_v52 }
 0x312   :  { %661 = vmatpush.bf16.msrb.mxu2 %v1816_v58 }
 0x316   :  { %662 = vmatpush.bf16.msrb.mxu2 %v1843_v35 }
 0x31a   :  { %663 = vmatpush.bf16.msrb.mxu2 %v1850_v43 }
 0x31e   :  { %664 = vmatpush.bf16.msrb.mxu2 %v1857_v53 }
 0x322   :  { %665 = vmatpush.bf16.msrb.mxu2 %v1864_v62 }
 0x388   :  { %v531_v55 = vpop.f32.mrf.mxu2 }
 0x389   :  { %v532_v61 = vadd.f32 %v1827_v60, %v531_v55 }
 0x38b   :  { %v536_v25 = vmax.f32 %v532_v61, 0.0 }
 0x390   :  { %v533_v63 = vpop.f32.mrf.mxu2 }
 0x391   :  { %v534_v23 = vadd.f32 %v1827_v60, %v533_v63 }
 0x393   :  { %v537_v26 = vmax.f32 %v534_v23, 0.0 }
 0x395   :  { %v538_v27 = vpack.c.bf16 %v537_v26, %v536_v25 }
 0x397   :  { %547 = vmatmul.bf16.vlgmr.msrb.gmra.mxu3 %v538_v27 }
 0x398   :  { %681 = vmatpush.bf16.msrb.mxu3 %v1700_v0 }
 0x39c   :  { %682 = vmatpush.bf16.msrb.mxu3 %v1703_v1 }
 0x3a0   :  { %683 = vmatpush.bf16.msrb.mxu3 %v1711_v4 }
 0x3a4   :  { %684 = vmatpush.bf16.msrb.mxu3 %v1717_v6 }
 0x3a8   :  { %685 = vmatpush.bf16.msrb.mxu3 %v1723_v8 }
 0x3ac   :  { %686 = vmatpush.bf16.msrb.mxu3 %v1727_v9 }
 0x3b0   :  { %687 = vmatpush.bf16.msrb.mxu3 %v1730_v10 }
 0x3b4   :  { %688 = vmatpush.bf16.msrb.mxu3 %v1733_v11 }
 0x41a   :  { %v548_v28 = vpop.f32.mrf.mxu3 }
 0x41b   :  { %v549_v30 = vadd.f32 %v1884_v14, %v548_v28 }
 0x41d   :  { %v553_v41 = vmax.f32 %v549_v30, 0.0 }
 0x422   :  { %v550_v39 = vpop.f32.mrf.mxu3 }
 0x423   :  { %v551_v36 = vadd.f32 %v1884_v14, %v550_v39 }
 0x425   :  { %v554_v44 = vmax.f32 %v551_v36, 0.0 }
 0x427   :  { %v555_v47 = vpack.c.bf16 %v554_v44, %v553_v41 }
 0x429   :  { %564 = vmatmul.bf16.vlgmr.msra.gmra.mxu0 %v555_v47  ;;  %578 = vmatmul.bf16.vlgmr.msra.gmra.mxu1 %v555_v47 }
 0x42a   :  { %698 = vmatpush.bf16.msra.mxu0 %v1705_v2  ;;  %715 = vmatpush.bf16.msra.mxu1 %v1755_v19 }
 0x42e   :  { %699 = vmatpush.bf16.msra.mxu0 %v1708_v3  ;;  %716 = vmatpush.bf16.msra.mxu1 %v1758_v20 }
 0x432   :  { %700 = vmatpush.bf16.msra.mxu0 %v1714_v5  ;;  %717 = vmatpush.bf16.msra.mxu1 %v1762_v21 }
 0x436   :  { %701 = vmatpush.bf16.msra.mxu0 %v1720_v7  ;;  %718 = vmatpush.bf16.msra.mxu1 %v1766_v22 }
 0x43a   :  { %702 = vmatpush.bf16.msra.mxu0 %v1742_v15  ;;  %719 = vmatpush.bf16.msra.mxu1 %v1778_v31 }
 0x43e   :  { %703 = vmatpush.bf16.msra.mxu0 %v1745_v16  ;;  %720 = vmatpush.bf16.msra.mxu1 %v1781_v32 }
 0x442   :  { %704 = vmatpush.bf16.msra.mxu0 %v1748_v17  ;;  %721 = vmatpush.bf16.msra.mxu1 %v1784_v33 }
 0x446   :  { %705 = vmatpush.bf16.msra.mxu0 %v1751_v18  ;;  %722 = vmatpush.bf16.msra.mxu1 %v1787_v34 }
 0x4a6   :  { %v579_v48 = vpop.f32.mrf.mxu1  ;;  %v565_v55 = vpop.f32.mrf.mxu0 }
 0x4a7   :  { %v580_v50 = vadd.f32 %v579_v48, %v1911_v37  ;;  %v566_v30 = vadd.f32 %v565_v55, %v1915_v56 }
 0x4a9   :  { %v584_v54 = vmul.f32 1.442695, %v580_v50 }
 0x4ab   :  { %1388 = vpow2.f32 %v584_v54 }
 0x4ae   :  { %v581_v61 = vpop.f32.mrf.mxu1  ;;  %v567_v26 = vpop.f32.mrf.mxu0 }
 0x4af   :  { %v582_v63 = vadd.f32 %v581_v61, %v1911_v37  ;;  %v568_v39 = vadd.f32 %v567_v26, %v1915_v56 }
 0x4b1   :  { %v586_v23 = vmul.f32 1.442695, %v582_v63  ;;  %v1389_v25 = vpop.eup %1388 }
 0x4b2   :  { %v588_v27 = vmul.f32 %v1389_v25, %v1735_v12 }
 0x4b3   :  { %1390 = vpow2.f32 %v586_v23 }
 0x4b4   :  { %v590_v41 = vadd.f32 %v588_v27, %v566_v30 }
 0x4b9   :  { %v1391_v28 = vpop.eup %1390 }
 0x4ba   :  { %v589_v36 = vmul.f32 %v1391_v28, %v1737_v13 }
 0x4bc   :  { %v591_v44 = vadd.f32 %v589_v36, %v568_v39 }
 0x4be   :  { %v592_v47 = vpack.c.bf16 %v591_v44, %v590_v41 }
 0x4c0   :  { %601 = vmatmul.bf16.vlgmr.msra.gmra.mxu2 %v592_v47 }
 0x4c1   :  { %732 = vmatpush.bf16.msra.mxu2 %v1791_v38 }
 0x4c5   :  { %733 = vmatpush.bf16.msra.mxu2 %v1797_v45 }
 0x4c9   :  { %734 = vmatpush.bf16.msra.mxu2 %v1805_v51 }
 0x4cd   :  { %735 = vmatpush.bf16.msra.mxu2 %v1813_v57 }
 0x4d1   :  { %736 = vmatpush.bf16.msra.mxu2 %v1841_v29 }
 0x4d5   :  { %737 = vmatpush.bf16.msra.mxu2 %v1848_v40 }
 0x4d9   :  { %738 = vmatpush.bf16.msra.mxu2 %v1855_v49 }
 0x4dd   :  { %739 = vmatpush.bf16.msra.mxu2 %v1862_v59 }
 0x543   :  { %v602_v48 = vpop.f32.mrf.mxu2 }
 0x544   :  { %v603_v50 = vadd.f32 %v1772_v24, %v602_v48 }
 0x546   :  { %v607_v61 = vmax.f32 %v603_v50, 0.0 }
 0x54b   :  { %v604_v54 = vpop.f32.mrf.mxu2 }
 0x54c   :  { %v605_v55 = vadd.f32 %v1772_v24, %v604_v54 }
 0x54e   :  { %v608_v63 = vmax.f32 %v605_v55, 0.0 }
 0x550   :  { %v609_v23 = vpack.c.bf16 %v608_v63, %v607_v61 }
 0x552   :  { %618 = vmatmul.bf16.vlgmr.msra.gmra.mxu3 %v609_v23 }
 0x553   :  { %746 = vmatpush.bf16.msra.mxu3 %v1793_v42 }
 0x557   :  { %747 = vmatpush.bf16.msra.mxu3 %v1800_v46 }
 0x55b   :  { %748 = vmatpush.bf16.msra.mxu3 %v1808_v52 }
 0x55f   :  { %749 = vmatpush.bf16.msra.mxu3 %v1816_v58 }
 0x563   :  { %750 = vmatpush.bf16.msra.mxu3 %v1843_v35 }
 0x567   :  { %751 = vmatpush.bf16.msra.mxu3 %v1850_v43 }
 0x56b   :  { %752 = vmatpush.bf16.msra.mxu3 %v1857_v53 }
 0x56f   :  { %753 = vmatpush.bf16.msra.mxu3 %v1864_v62 }
 0x5d5   :  { %v619_v25 = vpop.f32.mrf.mxu3 }
 0x5d6   :  { %v620_v26 = vadd.f32 %v1827_v60, %v619_v25 }
 0x5d8   :  { %v624_v30 = vmax.f32 %v620_v26, 0.0 }
 0x5dd   :  { %v621_v27 = vpop.f32.mrf.mxu3 }
 0x5de   :  { %v622_v28 = vadd.f32 %v1827_v60, %v621_v27 }
 0x5e0   :  { %v625_v39 = vmax.f32 %v622_v28, 0.0 }
 0x5e2   :  { %v626_v36 = vpack.c.bf16 %v625_v39, %v624_v30 }
 0x5e4   :  { %635 = vmatmul.bf16.vlgmr.msrb.gmra.mxu0 %v626_v36 }
 0x5e5   :  { %769 = vmatpush.bf16.msrb.mxu0 %v1700_v0 }
 0x5e9   :  { %770 = vmatpush.bf16.msrb.mxu0 %v1703_v1 }
 0x5ed   :  { %771 = vmatpush.bf16.msrb.mxu0 %v1711_v4 }
 0x5f1   :  { %772 = vmatpush.bf16.msrb.mxu0 %v1717_v6 }
 0x5f5   :  { %773 = vmatpush.bf16.msrb.mxu0 %v1723_v8 }
 0x5f9   :  { %774 = vmatpush.bf16.msrb.mxu0 %v1727_v9 }
 0x5fd   :  { %775 = vmatpush.bf16.msrb.mxu0 %v1730_v10 }
 0x601   :  { %776 = vmatpush.bf16.msrb.mxu0 %v1733_v11 }
 0x661   :  { %v636_v41 = vpop.f32.mrf.mxu0 }
 0x662   :  { %v637_v44 = vadd.f32 %v1884_v14, %v636_v41 }
 0x664   :  { %v641_v50 = vmax.f32 %v637_v44, 0.0 }
 0x669   :  { %v638_v47 = vpop.f32.mrf.mxu0 }
 0x66a   :  { %v639_v48 = vadd.f32 %v1884_v14, %v638_v47 }
 0x66c   :  { %v642_v54 = vmax.f32 %v639_v48, 0.0 }
 0x66e   :  { %v643_v55 = vpack.c.bf16 %v642_v54, %v641_v50 }
 0x670   :  { %652 = vmatmul.bf16.vlgmr.msrb.gmra.mxu1 %v643_v55  ;;  %666 = vmatmul.bf16.vlgmr.msrb.gmra.mxu2 %v643_v55 }
 0x671   :  { %786 = vmatpush.bf16.msrb.mxu1 %v1705_v2  ;;  %803 = vmatpush.bf16.msrb.mxu2 %v1755_v19 }
 0x675   :  { %787 = vmatpush.bf16.msrb.mxu1 %v1708_v3  ;;  %804 = vmatpush.bf16.msrb.mxu2 %v1758_v20 }
 0x679   :  { %788 = vmatpush.bf16.msrb.mxu1 %v1714_v5  ;;  %805 = vmatpush.bf16.msrb.mxu2 %v1762_v21 }
 0x67d   :  { %789 = vmatpush.bf16.msrb.mxu1 %v1720_v7  ;;  %806 = vmatpush.bf16.msrb.mxu2 %v1766_v22 }
 0x681   :  { %790 = vmatpush.bf16.msrb.mxu1 %v1742_v15  ;;  %807 = vmatpush.bf16.msrb.mxu2 %v1778_v31 }
 0x685   :  { %791 = vmatpush.bf16.msrb.mxu1 %v1745_v16  ;;  %808 = vmatpush.bf16.msrb.mxu2 %v1781_v32 }
 0x689   :  { %792 = vmatpush.bf16.msrb.mxu1 %v1748_v17  ;;  %809 = vmatpush.bf16.msrb.mxu2 %v1784_v33 }
 0x68d   :  { %793 = vmatpush.bf16.msrb.mxu1 %v1751_v18  ;;  %810 = vmatpush.bf16.msrb.mxu2 %v1787_v34 }
 0x6ed   :  { %v653_v25 = vpop.f32.mrf.mxu1 }
 0x6ee   :  { %v654_v44 = vadd.f32 %v653_v25, %v1915_v56 }
 0x6f3   :  { %v667_v61 = vpop.f32.mrf.mxu2 }
 0x6f4   :  { %v668_v63 = vadd.f32 %v667_v61, %v1911_v37 }
 0x6f5   :  { %v655_v39 = vpop.f32.mrf.mxu1 }
 0x6f6   :  { %v672_v23 = vmul.f32 1.442695, %v668_v63  ;;  %v656_v47 = vadd.f32 %v655_v39, %v1915_v56 }
 0x6f8   :  { %1392 = vpow2.f32 %v672_v23 }
 0x6fb   :  { %v669_v26 = vpop.f32.mrf.mxu2 }
 0x6fc   :  { %v670_v27 = vadd.f32 %v669_v26, %v1911_v37 }
 0x6fe   :  { %v674_v28 = vmul.f32 1.442695, %v670_v27  ;;  %v1393_v30 = vpop.eup %1392 }
 0x6ff   :  { %v676_v36 = vmul.f32 %v1393_v30, %v1735_v12 }
 0x700   :  { %1394 = vpow2.f32 %v674_v28 }
 0x701   :  { %v678_v50 = vadd.f32 %v676_v36, %v654_v44 }
 0x706   :  { %v1395_v41 = vpop.eup %1394 }
 0x707   :  { %v677_v48 = vmul.f32 %v1395_v41, %v1737_v13 }
 0x709   :  { %v679_v54 = vadd.f32 %v677_v48, %v656_v47 }
 0x70b   :  { %v680_v55 = vpack.c.bf16 %v679_v54, %v678_v50 }
 0x70d   :  { %689 = vmatmul.bf16.vlgmr.msrb.gmra.mxu3 %v680_v55 }
 0x70e   :  { %820 = vmatpush.bf16.msrb.mxu3 %v1791_v38 }
 0x712   :  { %821 = vmatpush.bf16.msrb.mxu3 %v1797_v45 }
 0x716   :  { %822 = vmatpush.bf16.msrb.mxu3 %v1805_v51 }
 0x71a   :  { %823 = vmatpush.bf16.msrb.mxu3 %v1813_v57 }
 0x71e   :  { %824 = vmatpush.bf16.msrb.mxu3 %v1841_v29 }
 0x722   :  { %825 = vmatpush.bf16.msrb.mxu3 %v1848_v40 }
 0x726   :  { %826 = vmatpush.bf16.msrb.mxu3 %v1855_v49 }
 0x72a   :  { %827 = vmatpush.bf16.msrb.mxu3 %v1862_v59 }
 0x790   :  { %v690_v61 = vpop.f32.mrf.mxu3 }
 0x791   :  { %v691_v63 = vadd.f32 %v1772_v24, %v690_v61 }
 0x793   :  { %v695_v26 = vmax.f32 %v691_v63, 0.0 }
 0x798   :  { %v692_v23 = vpop.f32.mrf.mxu3 }
 0x799   :  { %v693_v25 = vadd.f32 %v1772_v24, %v692_v23 }
 0x79b   :  { %v696_v27 = vmax.f32 %v693_v25, 0.0 }
 0x79d   :  { %v697_v28 = vpack.c.bf16 %v696_v27, %v695_v26 }
 0x79f   :  { %706 = vmatmul.bf16.vlgmr.msra.gmra.mxu0 %v697_v28 }
 0x7a0   :  { %834 = vmatpush.bf16.msra.mxu0 %v1793_v42 }
 0x7a4   :  { %835 = vmatpush.bf16.msra.mxu0 %v1800_v46 }
 0x7a8   :  { %836 = vmatpush.bf16.msra.mxu0 %v1808_v52 }
 0x7ac   :  { %837 = vmatpush.bf16.msra.mxu0 %v1816_v58 }
 0x7b0   :  { %838 = vmatpush.bf16.msra.mxu0 %v1843_v35 }
 0x7b4   :  { %839 = vmatpush.bf16.msra.mxu0 %v1850_v43 }
 0x7b8   :  { %840 = vmatpush.bf16.msra.mxu0 %v1857_v53 }
 0x7bc   :  { %841 = vmatpush.bf16.msra.mxu0 %v1864_v62 }
 0x81c   :  { %v707_v30 = vpop.f32.mrf.mxu0 }
 0x81d   :  { %v708_v39 = vadd.f32 %v1827_v60, %v707_v30 }
 0x81f   :  { %v712_v44 = vmax.f32 %v708_v39, 0.0 }
 0x824   :  { %v709_v36 = vpop.f32.mrf.mxu0 }
 0x825   :  { %v710_v41 = vadd.f32 %v1827_v60, %v709_v36 }
 0x827   :  { %v713_v47 = vmax.f32 %v710_v41, 0.0 }
 0x829   :  { %v714_v48 = vpack.c.bf16 %v713_v47, %v712_v44 }
 0x82b   :  { %723 = vmatmul.bf16.vlgmr.msra.gmra.mxu1 %v714_v48 }
 0x82c   :  { %857 = vmatpush.bf16.msra.mxu1 %v1700_v0 }
 0x830   :  { %858 = vmatpush.bf16.msra.mxu1 %v1703_v1 }
 0x834   :  { %859 = vmatpush.bf16.msra.mxu1 %v1711_v4 }
 0x838   :  { %860 = vmatpush.bf16.msra.mxu1 %v1717_v6 }
 0x83c   :  { %861 = vmatpush.bf16.msra.mxu1 %v1723_v8 }
 0x840   :  { %862 = vmatpush.bf16.msra.mxu1 %v1727_v9 }
 0x844   :  { %863 = vmatpush.bf16.msra.mxu1 %v1730_v10 }
 0x848   :  { %864 = vmatpush.bf16.msra.mxu1 %v1733_v11 }
 0x8a8   :  { %v724_v50 = vpop.f32.mrf.mxu1 }
 0x8a9   :  { %v725_v54 = vadd.f32 %v1884_v14, %v724_v50 }
 0x8ab   :  { %v729_v61 = vmax.f32 %v725_v54, 0.0 }
 0x8b0   :  { %v726_v55 = vpop.f32.mrf.mxu1 }
 0x8b1   :  { %v727_v0 = vadd.f32 %v1884_v14, %v726_v55 }
 0x8b3   :  { %v730_v1 = vmax.f32 %v727_v0, 0.0 }
 0x8b5   :  { %v731_v63 = vpack.c.bf16 %v730_v1, %v729_v61 }
 0x8b7   :  { %740 = vmatmul.bf16.vlgmr.msra.gmra.mxu2 %v731_v63  ;;  %754 = vmatmul.bf16.vlgmr.msra.gmra.mxu3 %v731_v63 }
 0x8b8   :  { %874 = vmatpush.bf16.msra.mxu2 %v1705_v2  ;;  %891 = vmatpush.bf16.msra.mxu3 %v1755_v19 }
 0x8bc   :  { %875 = vmatpush.bf16.msra.mxu2 %v1708_v3  ;;  %892 = vmatpush.bf16.msra.mxu3 %v1758_v20 }
 0x8c0   :  { %876 = vmatpush.bf16.msra.mxu2 %v1714_v5  ;;  %893 = vmatpush.bf16.msra.mxu3 %v1762_v21 }
 0x8c4   :  { %877 = vmatpush.bf16.msra.mxu2 %v1720_v7  ;;  %894 = vmatpush.bf16.msra.mxu3 %v1766_v22 }
 0x8c8   :  { %878 = vmatpush.bf16.msra.mxu2 %v1742_v15  ;;  %895 = vmatpush.bf16.msra.mxu3 %v1778_v31 }
 0x8cc   :  { %879 = vmatpush.bf16.msra.mxu2 %v1745_v16  ;;  %896 = vmatpush.bf16.msra.mxu3 %v1781_v32 }
 0x8d0   :  { %880 = vmatpush.bf16.msra.mxu2 %v1748_v17  ;;  %897 = vmatpush.bf16.msra.mxu3 %v1784_v33 }
 0x8d4   :  { %881 = vmatpush.bf16.msra.mxu2 %v1751_v18  ;;  %898 = vmatpush.bf16.msra.mxu3 %v1787_v34 }
 0x93a   :  { %v755_v2 = vpop.f32.mrf.mxu3  ;;  %v741_v5 = vpop.f32.mrf.mxu2 }
 0x93b   :  { %v756_v3 = vadd.f32 %v755_v2, %v1911_v37  ;;  %v742_v18 = vadd.f32 %v741_v5, %v1915_v56  ;;  %v2097_v2 = vld [vmem:[#allocation5 + $0x38] sm:$0xff] }
 0x93d   :  { %v760_v4 = vmul.f32 1.442695, %v756_v3  ;;  %v2100_v3 = vld [vmem:[#allocation5 + $0x30] sm:$0xff] }
 0x93f   :  { %1396 = vpow2.f32 %v760_v4  ;;  %v2103_v4 = vld [vmem:[#allocation5 + $0x28] sm:$0xff] }
 0x942   :  { %v757_v7 = vpop.f32.mrf.mxu3  ;;  %v743_v25 = vpop.f32.mrf.mxu2 }
 0x943   :  { %v758_v15 = vadd.f32 %v757_v7, %v1911_v37  ;;  %v744_v27 = vadd.f32 %v743_v25, %v1915_v56 }
 0x945   :  { %v762_v16 = vmul.f32 1.442695, %v758_v15  ;;  %v1397_v23 = vpop.eup %1396 }
 0x946   :  { %v764_v17 = vmul.f32 %v1397_v23, %v1735_v12 }
 0x947   :  { %1398 = vpow2.f32 %v762_v16 }
 0x948   :  { %v766_v30 = vadd.f32 %v764_v17, %v742_v18 }
 0x94d   :  { %v1399_v26 = vpop.eup %1398 }
 0x94e   :  { %v765_v28 = vmul.f32 %v1399_v26, %v1737_v13 }
 0x950   :  { %v767_v39 = vadd.f32 %v765_v28, %v744_v27 }
 0x952   :  { %v768_v36 = vpack.c.bf16 %v767_v39, %v766_v30 }
 0x954   :  { %777 = vmatmul.bf16.vlgmr.msrb.gmra.mxu0 %v768_v36 }
 0x955   :  { %908 = vmatpush.bf16.msrb.mxu0 %v1791_v38 }
 0x959   :  { %909 = vmatpush.bf16.msrb.mxu0 %v1797_v45 }
 0x95d   :  { %910 = vmatpush.bf16.msrb.mxu0 %v1805_v51 }
 0x961   :  { %911 = vmatpush.bf16.msrb.mxu0 %v1813_v57 }
 0x965   :  { %912 = vmatpush.bf16.msrb.mxu0 %v1841_v29 }
 0x969   :  { %913 = vmatpush.bf16.msrb.mxu0 %v1848_v40 }
 0x96d   :  { %914 = vmatpush.bf16.msrb.mxu0 %v1855_v49 }
 0x971   :  { %915 = vmatpush.bf16.msrb.mxu0 %v1862_v59 }
 0x9d1   :  { %v778_v12 = vpop.f32.mrf.mxu0 }
 0x9d2   :  { %v779_v13 = vadd.f32 %v1772_v24, %v778_v12 }
 0x9d4   :  { %v783_v47 = vmax.f32 %v779_v13, 0.0 }
 0x9d9   :  { %v780_v41 = vpop.f32.mrf.mxu0 }
 0x9da   :  { %v781_v44 = vadd.f32 %v1772_v24, %v780_v41  ;;  %v2152_v41 = vld [vmem:[#allocation2 + $0x8] sm:$0xff] }
 0x9dc   :  { %v784_v48 = vmax.f32 %v781_v44, 0.0 }
 0x9de   :  { %v785_v50 = vpack.c.bf16 %v784_v48, %v783_v47 }
 0x9e0   :  { %794 = vmatmul.bf16.vlgmr.msrb.gmra.mxu1 %v785_v50 }
 0x9e1   :  { %922 = vmatpush.bf16.msrb.mxu1 %v1793_v42 }
 0x9e5   :  { %923 = vmatpush.bf16.msrb.mxu1 %v1800_v46 }
 0x9e9   :  { %924 = vmatpush.bf16.msrb.mxu1 %v1808_v52 }
 0x9ed   :  { %925 = vmatpush.bf16.msrb.mxu1 %v1816_v58 }
 0x9f1   :  { %926 = vmatpush.bf16.msrb.mxu1 %v1843_v35 }
 0x9f5   :  { %927 = vmatpush.bf16.msrb.mxu1 %v1850_v43 }
 0x9f9   :  { %928 = vmatpush.bf16.msrb.mxu1 %v1857_v53 }
 0x9fd   :  { %929 = vmatpush.bf16.msrb.mxu1 %v1864_v62 }
 0xa5d   :  { %v795_v24 = vpop.f32.mrf.mxu1 }
 0xa5e   :  { %v796_v54 = vadd.f32 %v1827_v60, %v795_v24 }
 0xa60   :  { %v800_v61 = vmax.f32 %v796_v54, 0.0  ;;  %v2163_v54 = vld [vmem:[#allocation7] ss:$0 sm:$0xff] }
 0xa65   :  { %v797_v55 = vpop.f32.mrf.mxu1 }
 0xa66   :  { %v798_v0 = vadd.f32 %v1827_v60, %v797_v55 }
 0xa68   :  { %v801_v1 = vmax.f32 %v798_v0, 0.0 }
 0xa6a   :  { %v802_v63 = vpack.c.bf16 %v801_v1, %v800_v61 }
 0xa6c   :  { %811 = vmatmul.bf16.vlgmr.msrb.gmra.mxu2 %v802_v63 }
 0xa6d   :  { %945 = vmatpush.bf16.msrb.mxu2 %v2097_v2 }
 0xa71   :  { %946 = vmatpush.bf16.msrb.mxu2 %v2100_v3 }
 0xa75   :  { %947 = vmatpush.bf16.msrb.mxu2 %v2103_v4 }
 0xa79   :  { %948 = vmatpush.bf16.msrb.mxu2 %v1717_v6  ;;  %v2113_v6 = vld [vmem:[#allocation8 + $0x38] sm:$0xff] }
 0xa7d   :  { %949 = vmatpush.bf16.msrb.mxu2 %v1723_v8  ;;  %v2117_v8 = vld [vmem:[#allocation8 + $0x30] sm:$0xff] }
 0xa81   :  { %950 = vmatpush.bf16.msrb.mxu2 %v1727_v9  ;;  %v2121_v9 = vld [vmem:[#allocation8 + $0x28] sm:$0xff] }
 0xa85   :  { %951 = vmatpush.bf16.msrb.mxu2 %v1730_v10  ;;  %v2125_v10 = vld [vmem:[#allocation8 + $0x20] sm:$0xff] }
 0xa89   :  { %952 = vmatpush.bf16.msrb.mxu2 %v1733_v11  ;;  %v2129_v11 = vld [vmem:[#allocation8 + $0x18] sm:$0xff] }
 0xaef   :  { %v812_v5 = vpop.f32.mrf.mxu2 }
 0xaf0   :  { %v813_v7 = vadd.f32 %v1884_v14, %v812_v5 }
 0xaf2   :  { %v817_v23 = vmax.f32 %v813_v7, 0.0 }
 0xaf7   :  { %v814_v15 = vpop.f32.mrf.mxu2 }
 0xaf8   :  { %v815_v16 = vadd.f32 %v1884_v14, %v814_v15 }
 0xafa   :  { %v818_v25 = vmax.f32 %v815_v16, 0.0 }
 0xafc   :  { %v819_v17 = vpack.c.bf16 %v818_v25, %v817_v23 }
 0xafe   :  { %828 = vmatmul.bf16.vlgmr.msrb.gmra.mxu3 %v819_v17  ;;  %842 = vmatmul.bf16.vlgmr.msra.gmra.mxu0 %v819_v17 }
 0xaff   :  { %962 = vmatpush.bf16.msrb.mxu3 %v2113_v6  ;;  %979 = vmatpush.bf16.msra.mxu0 %v1755_v19  ;;  %v2133_v19 = vld [vmem:[#allocation8 + $0x10] sm:$0xff] }
 0xb03   :  { %963 = vmatpush.bf16.msrb.mxu3 %v2117_v8  ;;  %980 = vmatpush.bf16.msra.mxu0 %v1758_v20  ;;  %v2137_v20 = vld [vmem:[#allocation8 + $0x8] sm:$0xff] }
 0xb07   :  { %964 = vmatpush.bf16.msrb.mxu3 %v2121_v9  ;;  %981 = vmatpush.bf16.msra.mxu0 %v1762_v21  ;;  %v2141_v21 = vld [vmem:[#allocation8] sm:$0xff] }
 0xb0b   :  { %965 = vmatpush.bf16.msrb.mxu3 %v2125_v10  ;;  %982 = vmatpush.bf16.msra.mxu0 %v1766_v22 }
 0xb0f   :  { %966 = vmatpush.bf16.msrb.mxu3 %v2129_v11  ;;  %983 = vmatpush.bf16.msra.mxu0 %v1778_v31 }
 0xb13   :  { %967 = vmatpush.bf16.msrb.mxu3 %v2133_v19  ;;  %984 = vmatpush.bf16.msra.mxu0 %v1781_v32 }
 0xb17   :  { %968 = vmatpush.bf16.msrb.mxu3 %v2137_v20  ;;  %985 = vmatpush.bf16.msra.mxu0 %v1784_v33  ;;  %v2147_v33 = vld [vmem:[#allocation2] sm:$0xff] }
 0xb1b   :  { %969 = vmatpush.bf16.msrb.mxu3 %v2141_v21  ;;  %986 = vmatpush.bf16.msra.mxu0 %v1787_v34 }
 0xb7b   :  { %v843_v22 = vpop.f32.mrf.mxu0 }
 0xb7c   :  { %v844_v31 = vadd.f32 %v843_v22, %v1911_v37 }
 0xb7e   :  { %v848_v26 = vmul.f32 1.442695, %v844_v31  ;;  %v1430_v31 = vld [vmem:[#allocation5 + $0x20] sm:$0xff] }
 0xb80   :  { %1400 = vpow2.f32 %v848_v26  ;;  %v1431_v26 = vld [vmem:[#allocation5 + $0x18] sm:$0xff] }
 0xb81   :  { %v829_v18 = vpop.f32.mrf.mxu3 }
 0xb82   :  { %v830_v34 = vadd.f32 %v829_v18, %v1915_v56  ;;  %v1432_v18 = vld [vmem:[#allocation5 + $0x10] sm:$0xff] }
 0xb83   :  { %v845_v27 = vpop.f32.mrf.mxu0 }
 0xb84   :  { %v846_v32 = vadd.f32 %v845_v27, %v1911_v37  ;;  %v1433_v27 = vld [vmem:[#allocation5 + $0x8] sm:$0xff] }
 0xb86   :  { %v850_v28 = vmul.f32 1.442695, %v846_v32  ;;  %v1401_v30 = vpop.eup %1400  ;;  %v1434_v32 = vld [vmem:[#allocation5] sm:$0xff] }
 0xb87   :  { %v852_v36 = vmul.f32 %v2147_v33, %v1401_v30 }
 0xb88   :  { %1402 = vpow2.f32 %v850_v28 }
 0xb89   :  { %v831_v39 = vpop.f32.mrf.mxu3  ;;  %v854_v47 = vadd.f32 %v852_v36, %v830_v34  ;;  %v1437_v34 = vld [vmem:[#allocation8 + $0x68] sm:$0xff] }
 0xb8a   :  { %v832_v13 = vadd.f32 %v831_v39, %v1915_v56 }
 0xb8e   :  { %v1403_v12 = vpop.eup %1402 }
 0xb8f   :  { %v853_v44 = vmul.f32 %v2152_v41, %v1403_v12  ;;  %v1436_v12 = vld [vmem:[#allocation8 + $0x70] sm:$0xff] }
 0xb91   :  { %v855_v48 = vadd.f32 %v853_v44, %v832_v13  ;;  %v1438_v13 = vld [vmem:[#allocation8 + $0x60] sm:$0xff]  ;;  %v1439_v44 = vld [vmem:[#allocation8 + $0x58] sm:$0xff] }
 0xb93   :  { %v856_v50 = vpack.c.bf16 %v855_v48, %v854_v47 }
 0xb95   :  { %865 = vmatmul.bf16.vlgmr.msra.gmra.mxu1 %v856_v50 }
 0xb96   :  { %996 = vmatpush.bf16.msra.mxu1 %v1791_v38 }
 0xb9a   :  { %997 = vmatpush.bf16.msra.mxu1 %v1797_v45 }
 0xb9e   :  { %998 = vmatpush.bf16.msra.mxu1 %v1805_v51 }
 0xba2   :  { %999 = vmatpush.bf16.msra.mxu1 %v1813_v57 }
 0xba6   :  { %1000 = vmatpush.bf16.msra.mxu1 %v1841_v29 }
 0xbaa   :  { %1001 = vmatpush.bf16.msra.mxu1 %v1848_v40 }
 0xbae   :  { %1002 = vmatpush.bf16.msra.mxu1 %v1855_v49 }
 0xbb2   :  { %1003 = vmatpush.bf16.msra.mxu1 %v1862_v59 }
 0xc12   :  { %v866_v24 = vpop.f32.mrf.mxu1 }
 0xc13   :  { %v867_v55 = vadd.f32 %v2163_v54, %v866_v24 }
 0xc15   :  { %v871_v1 = vmax.f32 %v867_v55, 0.0 }
 0xc1a   :  { %v868_v0 = vpop.f32.mrf.mxu1 }
 0xc1b   :  { %v869_v61 = vadd.f32 %v2163_v54, %v868_v0 }
 0xc1d   :  { %v872_v63 = vmax.f32 %v869_v61, 0.0 }
 0xc1f   :  { %v873_v5 = vpack.c.bf16 %v872_v63, %v871_v1 }
 0xc21   :  { %882 = vmatmul.bf16.vlgmr.msra.gmra.mxu2 %v873_v5 }
 0xc22   :  { %1010 = vmatpush.bf16.msra.mxu2 %v1793_v42 }
 0xc26   :  { %1011 = vmatpush.bf16.msra.mxu2 %v1800_v46 }
 0xc2a   :  { %1012 = vmatpush.bf16.msra.mxu2 %v1808_v52 }
 0xc2e   :  { %1013 = vmatpush.bf16.msra.mxu2 %v1816_v58 }
 0xc32   :  { %1014 = vmatpush.bf16.msra.mxu2 %v1843_v35 }
 0xc36   :  { %1015 = vmatpush.bf16.msra.mxu2 %v1850_v43 }
 0xc3a   :  { %1016 = vmatpush.bf16.msra.mxu2 %v1857_v53 }
 0xc3e   :  { %1017 = vmatpush.bf16.msra.mxu2 %v1864_v62 }
 0xca4   :  { %v883_v7 = vpop.f32.mrf.mxu2 }
 0xca5   :  { %v884_v15 = vadd.f32 %v1827_v60, %v883_v7 }
 0xca7   :  { %v888_v25 = vmax.f32 %v884_v15, 0.0 }
 0xcac   :  { %v885_v16 = vpop.f32.mrf.mxu2 }
 0xcad   :  { %v886_v23 = vadd.f32 %v1827_v60, %v885_v16 }
 0xcaf   :  { %v889_v17 = vmax.f32 %v886_v23, 0.0 }
 0xcb1   :  { %v890_v22 = vpack.c.bf16 %v889_v17, %v888_v25 }
 0xcb3   :  { %899 = vmatmul.bf16.vlgmr.msra.gmra.mxu3 %v890_v22 }
 0xcb4   :  { %1033 = vmatpush.bf16.msra.mxu3 %v2097_v2 }
 0xcb8   :  { %1034 = vmatpush.bf16.msra.mxu3 %v2100_v3 }
 0xcbc   :  { %1035 = vmatpush.bf16.msra.mxu3 %v2103_v4  ;;  %v1435_v4 = vld [vmem:[#allocation8 + $0x78] sm:$0xff] }
 0xcc0   :  { %1036 = vmatpush.bf16.msra.mxu3 %v1430_v31 }
 0xcc4   :  { %1037 = vmatpush.bf16.msra.mxu3 %v1431_v26 }
 0xcc8   :  { %1038 = vmatpush.bf16.msra.mxu3 %v1432_v18 }
 0xccc   :  { %1039 = vmatpush.bf16.msra.mxu3 %v1433_v27 }
 0xcd0   :  { %1040 = vmatpush.bf16.msra.mxu3 %v1434_v32 }
 0xd36   :  { %v900_v60 = vpop.f32.mrf.mxu3 }
 0xd37   :  { %v901_v28 = vadd.f32 %v1884_v14, %v900_v60 }
 0xd39   :  { %v905_v39 = vmax.f32 %v901_v28, 0.0 }
 0xd3e   :  { %v902_v30 = vpop.f32.mrf.mxu3 }
 0xd3f   :  { %v903_v2 = vadd.f32 %v1884_v14, %v902_v30 }
 0xd41   :  { %v906_v3 = vmax.f32 %v903_v2, 0.0 }
 0xd43   :  { %v907_v36 = vpack.c.bf16 %v906_v3, %v905_v39 }
 0xd45   :  { %916 = vmatmul.bf16.vlgmr.msrb.gmra.mxu0 %v907_v36  ;;  %930 = vmatmul.bf16.vlgmr.msrb.gmra.mxu1 %v907_v36 }
 0xd46   :  { %1050 = vmatpush.bf16.msrb.mxu0 %v2113_v6  ;;  %1067 = vmatpush.bf16.msrb.mxu1 %v1435_v4  ;;  %v1440_v6 = vld [vmem:[#allocation8 + $0x50] sm:$0xff] }
 0xd4a   :  { %1051 = vmatpush.bf16.msrb.mxu0 %v2117_v8  ;;  %1068 = vmatpush.bf16.msrb.mxu1 %v1436_v12  ;;  %v1441_v8 = vld [vmem:[#allocation8 + $0x48] sm:$0xff] }
 0xd4e   :  { %1052 = vmatpush.bf16.msrb.mxu0 %v2121_v9  ;;  %1069 = vmatpush.bf16.msrb.mxu1 %v1437_v34  ;;  %v1442_v9 = vld [vmem:[#allocation8 + $0x40] sm:$0xff] }
 0xd52   :  { %1053 = vmatpush.bf16.msrb.mxu0 %v2125_v10  ;;  %1070 = vmatpush.bf16.msrb.mxu1 %v1438_v13 }
 0xd56   :  { %1054 = vmatpush.bf16.msrb.mxu0 %v2129_v11  ;;  %1071 = vmatpush.bf16.msrb.mxu1 %v1439_v44 }
 0xd5a   :  { %1055 = vmatpush.bf16.msrb.mxu0 %v2133_v19  ;;  %1072 = vmatpush.bf16.msrb.mxu1 %v1440_v6 }
 0xd5e   :  { %1056 = vmatpush.bf16.msrb.mxu0 %v2137_v20  ;;  %1073 = vmatpush.bf16.msrb.mxu1 %v1441_v8 }
 0xd62   :  { %1057 = vmatpush.bf16.msrb.mxu0 %v2141_v21  ;;  %1074 = vmatpush.bf16.msrb.mxu1 %v1442_v9 }
 0xdc2   :  { %v931_v47 = vpop.f32.mrf.mxu1  ;;  %v917_v50 = vpop.f32.mrf.mxu0 }
 0xdc3   :  { %v932_v10 = vadd.f32 %v931_v47, %v1911_v37  ;;  %v918_v21 = vadd.f32 %v917_v50, %v1915_v56 }
 0xdc5   :  { %v936_v48 = vmul.f32 1.442695, %v932_v10 }
 0xdc7   :  { %1404 = vpow2.f32 %v936_v48 }
 0xdca   :  { %v933_v11 = vpop.f32.mrf.mxu1  ;;  %v919_v0 = vpop.f32.mrf.mxu0 }
 0xdcb   :  { %v934_v24 = vadd.f32 %v933_v11, %v1911_v37  ;;  %v920_v1 = vadd.f32 %v919_v0, %v1915_v56 }
 0xdcd   :  { %v938_v19 = vmul.f32 1.442695, %v934_v24  ;;  %v1405_v55 = vpop.eup %1404 }
 0xdce   :  { %v940_v20 = vmul.f32 %v2147_v33, %v1405_v55 }
 0xdcf   :  { %1406 = vpow2.f32 %v938_v19 }
 0xdd0   :  { %v942_v5 = vadd.f32 %v940_v20, %v918_v21 }
 0xdd5   :  { %v1407_v61 = vpop.eup %1406 }
 0xdd6   :  { %v941_v63 = vmul.f32 %v2152_v41, %v1407_v61 }
 0xdd8   :  { %v943_v7 = vadd.f32 %v941_v63, %v920_v1 }
 0xdda   :  { %v944_v15 = vpack.c.bf16 %v943_v7, %v942_v5 }
 0xddc   :  { %953 = vmatmul.bf16.vlgmr.msrb.gmra.mxu2 %v944_v15 }
 0xddd   :  { %1084 = vmatpush.bf16.msrb.mxu2 %v1791_v38 }
 0xde1   :  { %1085 = vmatpush.bf16.msrb.mxu2 %v1797_v45 }
 0xde5   :  { %1086 = vmatpush.bf16.msrb.mxu2 %v1805_v51 }
 0xde9   :  { %1087 = vmatpush.bf16.msrb.mxu2 %v1813_v57  ;;  %v1443_v57 = vld [vmem:[%s2251_s4] ss:$0 sm:$0xff] }
 0xded   :  { %1088 = vmatpush.bf16.msrb.mxu2 %v1841_v29 }
 0xdf1   :  { %1089 = vmatpush.bf16.msrb.mxu2 %v1848_v40 }
 0xdf5   :  { %1090 = vmatpush.bf16.msrb.mxu2 %v1855_v49 }
 0xdf9   :  { %1091 = vmatpush.bf16.msrb.mxu2 %v1862_v59 }
 0xe5f   :  { %v954_v16 = vpop.f32.mrf.mxu2 }
 0xe60   :  { %v955_v23 = vadd.f32 %v2163_v54, %v954_v16 }
 0xe62   :  { %v959_v17 = vmax.f32 %v955_v23, 0.0 }
 0xe67   :  { %v956_v25 = vpop.f32.mrf.mxu2 }
 0xe68   :  { %v957_v38 = vadd.f32 %v2163_v54, %v956_v25 }
 0xe6a   :  { %v960_v45 = vmax.f32 %v957_v38, 0.0 }
 0xe6c   :  { %v961_v22 = vpack.c.bf16 %v960_v45, %v959_v17 }
 0xe6e   :  { %970 = vmatmul.bf16.vlgmr.msrb.gmra.mxu3 %v961_v22 }
 0xe6f   :  { %1098 = vmatpush.bf16.msrb.mxu3 %v1793_v42 }
 0xe73   :  { %1099 = vmatpush.bf16.msrb.mxu3 %v1800_v46 }
 0xe77   :  { %1100 = vmatpush.bf16.msrb.mxu3 %v1808_v52 }
 0xe7b   :  { %1101 = vmatpush.bf16.msrb.mxu3 %v1816_v58 }
 0xe7f   :  { %1102 = vmatpush.bf16.msrb.mxu3 %v1843_v35 }
 0xe83   :  { %1103 = vmatpush.bf16.msrb.mxu3 %v1850_v43 }
 0xe87   :  { %1104 = vmatpush.bf16.msrb.mxu3 %v1857_v53  ;;  %v1444_v53 = vld [vmem:[%s2251_s4 + $0x1] ss:$0 sm:$0xff]  ;;  %s1632_s4 = smov [#allocation11]  }
 0xe88   :  { %s1134_s16 = sshll.u32 %s1632_s4, 4  ;;  %s1135_s16 = int_to_ptr.vmem [resolvable:$true] %s1134_s16 }
 0xe8b   :  { %1105 = vmatpush.bf16.msrb.mxu3 %v1864_v62 }
 0xef1   :  { %v971_v51 = vpop.f32.mrf.mxu3 }
 0xef2   :  { %v972_v42 = vadd.f32 %v1443_v57, %v971_v51 }
 0xef4   :  { %v976_v40 = vmax.f32 %v972_v42, 0.0 }
 0xef9   :  { %v973_v29 = vpop.f32.mrf.mxu3 }
 0xefa   :  { %v974_v46 = vadd.f32 %v1443_v57, %v973_v29 }
 0xefc   :  { %v977_v52 = vmax.f32 %v974_v46, 0.0 }
 0xefe   :  { %v978_v49 = vpack.c.bf16 %v977_v52, %v976_v40 }
 0xf00   :  { %987 = vmatmul.bf16.vlgmr.msra.gmra.mxu0 %v978_v49 }
 0xf7d   :  { %v988_v58 = vpop.f32.mrf.mxu0 }
 0xf7e   :  { %v989_v35 = vadd.f32 %v1884_v14, %v988_v58 }
 0xf80   :  { %v993_v62 = vmax.f32 %v989_v35, 0.0 }
 0xf85   :  { %v990_v43 = vpop.f32.mrf.mxu0 }
 0xf86   :  { %v991_v59 = vadd.f32 %v1444_v53, %v990_v43 }
 0xf88   :  { %v994_v31 = vmax.f32 %v991_v59, 0.0 }
 0xf8a   :  { %v995_v26 = vpack.c.bf16 %v994_v31, %v993_v62 }
 0xf8c   :  { %1004 = vmatmul.bf16.vlgmr.msra.gmra.mxu1 %v995_v26  ;;  %1018 = vmatmul.bf16.vlgmr.msra.gmra.mxu2 %v995_v26 }
0x1009   :  { %v1005_v60 = vpop.f32.mrf.mxu1 }
0x100a   :  { %v1006_v4 = vadd.f32 %v1005_v60, %v1915_v56 }
0x100f   :  { %v1019_v18 = vpop.f32.mrf.mxu2 }
0x1010   :  { %v1020_v27 = vadd.f32 %v1019_v18, %v1911_v37 }
0x1011   :  { %v1007_v39 = vpop.f32.mrf.mxu1 }
0x1012   :  { %v1024_v32 = vmul.f32 1.442695, %v1020_v27  ;;  %v1008_v12 = vadd.f32 %v1007_v39, %v1915_v56 }
0x1014   :  { %1408 = vpow2.f32 %v1024_v32 }
0x1017   :  { %v1021_v28 = vpop.f32.mrf.mxu2 }
0x1018   :  { %v1022_v14 = vadd.f32 %v1021_v28, %v1911_v37 }
0x101a   :  { %v1026_v30 = vmul.f32 1.442695, %v1022_v14  ;;  %v1409_v2 = vpop.eup %1408 }
0x101b   :  { %v1028_v3 = vmul.f32 %v2147_v33, %v1409_v2 }
0x101c   :  { %1410 = vpow2.f32 %v1026_v30 }
0x101d   :  { %v1030_v13 = vadd.f32 %v1028_v3, %v1006_v4 }
0x1022   :  { %v1411_v36 = vpop.eup %1410 }
0x1023   :  { %v1029_v34 = vmul.f32 %v2152_v41, %v1411_v36 }
0x1025   :  { %v1031_v44 = vadd.f32 %v1029_v34, %v1008_v12 }
0x1027   :  { %v1032_v6 = vpack.c.bf16 %v1031_v44, %v1030_v13 }
0x1029   :  { %1041 = vmatmul.bf16.vlgmr.msra.gmra.mxu3 %v1032_v6 }
0x10ac   :  { %v1042_v8 = vpop.f32.mrf.mxu3 }
0x10ad   :  { %v1043_v9 = vadd.f32 %v2163_v54, %v1042_v8 }
0x10af   :  { %v1047_v48 = vmax.f32 %v1043_v9, 0.0 }
0x10b4   :  { %v1044_v47 = vpop.f32.mrf.mxu3 }
0x10b5   :  { %v1045_v10 = vadd.f32 %v2163_v54, %v1044_v47 }
0x10b7   :  { %v1048_v50 = vmax.f32 %v1045_v10, 0.0 }
0x10b9   :  { %v1049_v11 = vpack.c.bf16 %v1048_v50, %v1047_v48 }
0x10bb   :  { %1058 = vmatmul.bf16.vlgmr.msrb.gmra.mxu0 %v1049_v11 }
0x1138   :  { %v1059_v24 = vpop.f32.mrf.mxu0 }
0x1139   :  { %v1060_v19 = vadd.f32 %v1443_v57, %v1059_v24 }
0x113b   :  { %v1064_v20 = vmax.f32 %v1060_v19, 0.0 }
0x1140   :  { %v1061_v55 = vpop.f32.mrf.mxu0 }
0x1141   :  { %v1062_v0 = vadd.f32 %v1443_v57, %v1061_v55 }
0x1143   :  { %v1065_v61 = vmax.f32 %v1062_v0, 0.0 }
0x1145   :  { %v1066_v21 = vpack.c.bf16 %v1065_v61, %v1064_v20 }
0x1147   :  { %1075 = vmatmul.bf16.vlgmr.msrb.gmra.mxu1 %v1066_v21 }
0x11c4   :  { %v1076_v1 = vpop.f32.mrf.mxu1 }
0x11c5   :  { %v1077_v63 = vadd.f32 %v1444_v53, %v1076_v1 }
0x11c7   :  { %v1081_v15 = vmax.f32 %v1077_v63, 0.0 }
0x11cc   :  { %v1078_v5 = vpop.f32.mrf.mxu1 }
0x11cd   :  { %v1079_v7 = vadd.f32 %v1444_v53, %v1078_v5 }
0x11cf   :  { %v1082_v16 = vmax.f32 %v1079_v7, 0.0 }
0x11d1   :  { %v1083_v23 = vpack.c.bf16 %v1082_v16, %v1081_v15 }
0x11d3   :  { %1092 = vmatmul.bf16.vlgmr.msrb.gmra.mxu2 %v1083_v23  ;;  %1106 = vmatmul.bf16.vlgmr.msrb.gmra.mxu3 %v1083_v23 }
0x1256   :  { %v1107_v54 = vpop.f32.mrf.mxu3  ;;  %v1093_v17 = vpop.f32.mrf.mxu2 }
0x1257   :  { %v1108_v25 = vadd.f32 %v1107_v54, %v1911_v37  ;;  %v1094_v42 = vadd.f32 %v1093_v17, %v1915_v56 }
0x1259   :  { %v1112_v38 = vmul.f32 1.442695, %v1108_v25  ;;  %1122 = vadd.xlane.f32.xlu0 %v1108_v25 }
0x125b   :  { %1412 = vpow2.f32 %v1112_v38 }
0x125e   :  { %v1109_v45 = vpop.f32.mrf.mxu3  ;;  %v1095_v40 = vpop.f32.mrf.mxu2 }
0x125f   :  { %v1110_v22 = vadd.f32 %v1109_v45, %v1911_v37  ;;  %v1096_v37 = vadd.f32 %v1095_v40, %v1915_v56 }
0x1261   :  { %v1413_v51 = vpop.eup %1412  ;;  %v1114_v57 = vmul.f32 1.442695, %v1110_v22  ;;  %1124 = vadd.xlane.f32.xlu0 %v1110_v22 }
0x1262   :  { %v1116_v29 = vmul.f32 %v2147_v33, %v1413_v51 }
0x1263   :  { %1414 = vpow2.f32 %v1114_v57 }
0x1264   :  { %v1118_v46 = vadd.f32 %v1116_v29, %v1094_v42 }
0x1266   :  { %1120 = vst [vmem:[#allocation11] sm:$0xff] %v1118_v46 }
0x1269   :  { %v1415_v52 = vpop.eup %1414 }
0x126a   :  { %v1117_v49 = vmul.f32 %v2152_v41, %v1415_v52 }
0x126c   :  { %v1119_v58 = vadd.f32 %v1117_v49, %v1096_v37 }
0x126e   :  { %1121 = vst [vmem:[#allocation11 + $0x8] sm:$0xff] %v1119_v58 }
0x126f   :  { %1142 = dma.vmem_to_hbm [thread:$0]  %s1135_s16, 256, %s1137_s19, [#allocation4], %s1628_s23, %s1628_s23, %s1629_s24  }
0x12cc   :  { %v1123_v33 = vpop.xlane.xlu0 %1122 }
0x12cd   :  { %v1126_v35 = vsub.f32 0.0, %v1123_v33 }
0x12cf   :  { %1128 = vst [vmem:[#allocation12] sm:$0xff] %v1126_v35 }
0x12d4   :  { %v1125_v56 = vpop.xlane.xlu0 %1124 }
0x12d5   :  { %v1127_v43 = vsub.f32 0.0, %v1125_v56 }
0x12d7   :  { %1129 = vst [vmem:[#allocation12 + $0x8] sm:$0xff] %v1127_v43 }
0x12d8   :  { %1155 = dma.vmem_to_hbm [thread:$0]  %s1148_s20, 256, %s1150_s7, [#allocation13], %s1628_s23, %s1628_s23, %s1629_s24  }
0x12d9   :  { %1619 = dma.done.wait [#allocation4], 256  }
0x12da   :  { %1620 = vsyncadd [#allocation4], 4294967040 }
0x12db   :  { %1621 = dma.done.wait [#allocation13], 256  }
0x12dc   :  { %1622 = vsyncadd [#allocation13], 4294967040 }
0x12dd   :  { %1164 = vsyncpa [#allocation3], 1 }
0x12de   :  { %1165 = vsyncpa [#allocation6], 1 }
0x12df   :  { %1166 = vsyncpa [#allocation9], 1 }
0x12e0   :  { %1167 = vsyncpa [#allocation4], 1 }
0x12e1   :  { %1168 = vsyncpa [#allocation13], 1 }

</bundles_post_ra>
